<compile_context>
chip_gen: v6e
topology: v6e:2x2x1
jax: 0.10.0
libtpu: 0.0.40
codegen_flags: <defaults>
</compile_context>

<pallas_src>
import functools
import math

import jax
import jax.numpy as jnp
from jax.experimental import pallas as pl
from jax.experimental.pallas import tpu as pltpu

EPS_IN = 1e-3     # nn.InstanceNorm2d(channels, eps=0.001)
EPS_BN = 1e-5     # nn.BatchNorm1d/2d default eps
NUM_HEADS = 4     # AttentionalPropagation(feature_dim, 4)

_PARALLEL_1D = pltpu.CompilerParams(dimension_semantics=("parallel",))


# --------------------------------------------------------------------------
# Kernels
# --------------------------------------------------------------------------

def _inorm_qkv_kernel(x_ref, w_ref, b_ref, xn_ref, qkv_ref):
    """Per-batch: InstanceNorm over the lane (points) axis, then fused q/k/v
    1x1-conv projection (stacked weight).  Outputs both xn (needed later for
    the MLP concat) and qkv, in one pass over x."""
    x = x_ref[0]                                          # (C, P)
    mean = jnp.mean(x, axis=-1, keepdims=True)
    xc = x - mean
    var = jnp.mean(xc * xc, axis=-1, keepdims=True)       # biased, like PyTorch
    xn = xc * jax.lax.rsqrt(var + EPS_IN)
    xn_ref[0] = xn
    qkv_ref[0] = (jnp.dot(w_ref[...], xn, preferred_element_type=jnp.float32)
                  + b_ref[...])


def _attn_kernel(qt_ref, k_ref, vt_ref, o_ref, *, scale):
    """Per (batch*head) softmax attention.  q/v come in (N, Dh), k in (Dh, N)
    so both matmuls are plain (non-transposed) MXU matmuls."""
    qt = qt_ref[0]                                        # (N, Dh)
    k = k_ref[0]                                          # (Dh, N)
    vt = vt_ref[0]                                        # (N, Dh)
    s = jnp.dot(qt, k, preferred_element_type=jnp.float32) * scale   # (N, N)
    s = s - jnp.max(s, axis=-1, keepdims=True)
    p = jnp.exp(s)
    p = p * pl.reciprocal(jnp.sum(p, axis=-1, keepdims=True), approx=True)
    o_ref[0] = jnp.dot(p, vt, preferred_element_type=jnp.float32)    # (N, Dh)


def _conv1x1_kernel(x_ref, w_ref, b_ref, o_ref):
    """Per-batch 1x1 conv: out = W @ x + b."""
    o_ref[0] = (jnp.dot(w_ref[...], x_ref[0], preferred_element_type=jnp.float32)
                + b_ref[...])


def _scale_relu_conv_kernel(x_ref, s_ref, t_ref, w_ref, b_ref, o_ref):
    """Per-batch: channel-wise (sublane) affine (folded BatchNorm1d) -> ReLU ->
    1x1 conv."""
    y = jnp.maximum(x_ref[0] * s_ref[...] + t_ref[...], 0.0)
    o_ref[0] = (jnp.dot(w_ref[...], y, preferred_element_type=jnp.float32)
                + b_ref[...])


def _scale_relu_conv_res_kernel(x_ref, s_ref, t_ref, w_ref, b_ref, r_ref, o_ref):
    """Same as above with a fused residual add (saves one full HBM pass)."""
    y = jnp.maximum(x_ref[0] * s_ref[...] + t_ref[...], 0.0)
    o_ref[0] = (jnp.dot(w_ref[...], y, preferred_element_type=jnp.float32)
                + b_ref[...] + r_ref[0])


def _bnp_relu_rconv_res_kernel(x_ref, s_ref, t_ref, wt_ref, b_ref, o_ref):
    """conv2 branch in (C, P) layout: BatchNorm over the lane (points) axis
    (folded to scale/shift rows) -> ReLU -> right-matmul by W^T (the 1x1 conv
    over the points axis) -> bias row -> fused residual: out = x + conv2(x)."""
    x = x_ref[0]                                          # (C, P)
    y = jnp.maximum(x * s_ref[...] + t_ref[...], 0.0)
    z = jnp.dot(y, wt_ref[...], preferred_element_type=jnp.float32) + b_ref[...]
    o_ref[0] = x + z


# --------------------------------------------------------------------------
# pallas_call wrappers
# --------------------------------------------------------------------------

def inorm_qkv(x, w_qkv, b_qkv):
    B, C, N = x.shape
    C3 = w_qkv.shape[0]
    b2 = b_qkv.reshape(C3, 1)
    return pl.pallas_call(
        _inorm_qkv_kernel,
        out_shape=(jax.ShapeDtypeStruct((B, C, N), x.dtype),
                   jax.ShapeDtypeStruct((B, C3, N), x.dtype)),
        grid=(B,),
        in_specs=[pl.BlockSpec((1, C, N), lambda b: (b, 0, 0)),
                  pl.BlockSpec((C3, C), lambda b: (0, 0)),
                  pl.BlockSpec((C3, 1), lambda b: (0, 0))],
        out_specs=(pl.BlockSpec((1, C, N), lambda b: (b, 0, 0)),
                   pl.BlockSpec((1, C3, N), lambda b: (b, 0, 0))),
        compiler_params=_PARALLEL_1D,
    )(x, w_qkv, b2)


def mha_attention(qt, k, vt):
    BH, N, Dh = qt.shape
    kern = functools.partial(_attn_kernel, scale=1.0 / math.sqrt(Dh))
    return pl.pallas_call(
        kern,
        out_shape=jax.ShapeDtypeStruct((BH, N, Dh), qt.dtype),
        grid=(BH,),
        in_specs=[pl.BlockSpec((1, N, Dh), lambda i: (i, 0, 0)),
                  pl.BlockSpec((1, Dh, N), lambda i: (i, 0, 0)),
                  pl.BlockSpec((1, N, Dh), lambda i: (i, 0, 0))],
        out_specs=pl.BlockSpec((1, N, Dh), lambda i: (i, 0, 0)),
        compiler_params=_PARALLEL_1D,
        cost_estimate=pl.CostEstimate(
            flops=4 * BH * N * N * Dh,
            transcendentals=BH * N * N,
            bytes_accessed=16 * BH * N * Dh),
    )(qt, k, vt)


def conv1x1(x, w, b):
    B, Cin, N = x.shape
    Cout = w.shape[0]
    b2 = b.reshape(Cout, 1)
    return pl.pallas_call(
        _conv1x1_kernel,
        out_shape=jax.ShapeDtypeStruct((B, Cout, N), x.dtype),
        grid=(B,),
        in_specs=[pl.BlockSpec((1, Cin, N), lambda i: (i, 0, 0)),
                  pl.BlockSpec((Cout, Cin), lambda i: (0, 0)),
                  pl.BlockSpec((Cout, 1), lambda i: (0, 0))],
        out_specs=pl.BlockSpec((1, Cout, N), lambda i: (i, 0, 0)),
        compiler_params=_PARALLEL_1D,
    )(x, w, b2)


def bn_relu_conv1x1(x, mean, var, w, b, residual=None):
    """BatchNorm1d (batch stats, weight=1/bias=0) -> ReLU -> 1x1 conv,
    optionally with a fused residual add."""
    B, Cin, N = x.shape
    Cout = w.shape[0]
    inv = jax.lax.rsqrt(var + EPS_BN)
    s = inv.reshape(Cin, 1).astype(x.dtype)
    t = (-mean * inv).reshape(Cin, 1).astype(x.dtype)
    b2 = b.reshape(Cout, 1)
    in_specs = [pl.BlockSpec((1, Cin, N), lambda i: (i, 0, 0)),
                pl.BlockSpec((Cin, 1), lambda i: (0, 0)),
                pl.BlockSpec((Cin, 1), lambda i: (0, 0)),
                pl.BlockSpec((Cout, Cin), lambda i: (0, 0)),
                pl.BlockSpec((Cout, 1), lambda i: (0, 0))]
    args = [x, s, t, w, b2]
    kern = _scale_relu_conv_kernel
    if residual is not None:
        in_specs.append(pl.BlockSpec((1, Cout, N), lambda i: (i, 0, 0)))
        args.append(residual)
        kern = _scale_relu_conv_res_kernel
    return pl.pallas_call(
        kern,
        out_shape=jax.ShapeDtypeStruct((B, Cout, N), x.dtype),
        grid=(B,),
        in_specs=in_specs,
        out_specs=pl.BlockSpec((1, Cout, N), lambda i: (i, 0, 0)),
        compiler_params=_PARALLEL_1D,
    )(*args)


def points_bn_relu_conv_residual(x, mean_p, var_p, w_p, b_p):
    """PyTorch conv2 branch + residual, kept in (B, C, P) physical layout:
    out = x + Conv2d_P(ReLU(BatchNorm2d_P(x))).  The logical trans(1,2) is a
    layout choice only — the conv over the points axis becomes x @ W^T."""
    B, C, P = x.shape
    inv = jax.lax.rsqrt(var_p + EPS_BN)
    s = inv.reshape(1, P).astype(x.dtype)
    t = (-mean_p * inv).reshape(1, P).astype(x.dtype)
    wt = w_p.T                        # (P_in, P_out), one-time host transpose
    brow = b_p.reshape(1, P)
    return pl.pallas_call(
        _bnp_relu_rconv_res_kernel,
        out_shape=jax.ShapeDtypeStruct((B, C, P), x.dtype),
        grid=(B,),
        in_specs=[pl.BlockSpec((1, C, P), lambda i: (i, 0, 0)),
                  pl.BlockSpec((1, P), lambda i: (0, 0)),
                  pl.BlockSpec((1, P), lambda i: (0, 0)),
                  pl.BlockSpec((P, P), lambda i: (0, 0)),
                  pl.BlockSpec((1, P), lambda i: (0, 0))],
        out_specs=pl.BlockSpec((1, C, P), lambda i: (i, 0, 0)),
        compiler_params=_PARALLEL_1D,
    )(x, s, t, wt, brow)


# --------------------------------------------------------------------------
# Module forward (wrapper does only metadata / tiny layout plumbing)
# --------------------------------------------------------------------------

def inorm_gnn_block(x, p, residual=None):
    """InstanceNorm2d -> squeeze(-1) -> AttentionalGNN_layer (SuperGlue
    AttentionalPropagation(x, x)), in channels-first (B, D, N) layout.
    Optionally fuses a residual add into the final MLP conv kernel."""
    B, D, N = x.shape
    H = NUM_HEADS
    Dh = D // H

    xn, qkv = inorm_qkv(x, p["w_qkv"], p["b_qkv"])        # fused IN + q/k/v
    q, k, v = qkv[:, :D], qkv[:, D:2 * D], qkv[:, 2 * D:]

    # SuperGlue head split: (B, D, N) -> view (B, Dh, H, N).  These reshapes /
    # transposes are wrapper-side layout plumbing on tiny tensors.
    def to_ndh(t):                                        # -> (B*H, N, Dh)
        return t.reshape(B, Dh, H, N).transpose(0, 2, 3, 1).reshape(B * H, N, Dh)

    qt = to_ndh(q)
    vt = to_ndh(v)
    kh = k.reshape(B, Dh, H, N).transpose(0, 2, 1, 3).reshape(B * H, Dh, N)

    ot = mha_attention(qt, kh, vt)                        # (B*H, N, Dh)
    msg = ot.reshape(B, H, N, Dh).transpose(0, 3, 1, 2).reshape(B, D, N)
    msg = conv1x1(msg, p["w_merge"], p["b_merge"])        # merge projection

    # MLP([2D, 2D, D]): Conv1d -> BatchNorm1d -> ReLU -> Conv1d (bias init 0).
    h = conv1x1(jnp.concatenate([xn, msg], axis=1), p["w_mlp1"], p["b_mlp1"])
    mean = jnp.mean(h, axis=(0, 2))                       # BN1d batch stats
    var = jnp.mean(jnp.square(h - mean[None, :, None]), axis=(0, 2))
    return bn_relu_conv1x1(h, mean, var, p["w_mlp2"], p["b_mlp2"],
                           residual=residual)


def oafilter_gnn_forward(x, params):
    """OAFilter_GNN.forward.  x: (B, C, P, 1) -> (B, C, P, 1).
    squeeze / unsqueeze / trans are metadata-only (no copy kernels)."""
    B, C, P, _ = x.shape
    x3 = x.reshape(B, C, P)                               # squeeze(-1)

    # conv1: InstanceNorm2d(C) -> squeeze -> GNN -> unsqueeze -> trans(1,2).
    # We keep the physical (B, C, P) layout (P lane-dense); the trailing
    # unsqueeze/trans are logical only and conv2 is expressed accordingly.
    out1 = inorm_gnn_block(x3, params["gnn1"])            # (B, C, P)

    # out = out1 + conv2(out1);  conv2 = BatchNorm2d(P) -> ReLU -> Conv2d(P,P,1)
    mean_p = jnp.mean(out1, axis=(0, 1))                  # BN2d batch stats / p
    var_p = jnp.mean(jnp.square(out1 - mean_p[None, None, :]), axis=(0, 1))
    out2 = points_bn_relu_conv_residual(out1, mean_p, var_p,
                                        params["w_conv2"], params["b_conv2"])

    # conv3: trans(1,2) [metadata] -> InstanceNorm2d(C) -> squeeze -> GNN ->
    # unsqueeze.  Final "+ x" residual (shot_cut is None) fused into the last
    # MLP conv kernel.
    out3 = inorm_gnn_block(out2, params["gnn2"], residual=x3)

    return out3.reshape(B, C, P, 1)                       # unsqueeze(-1)


# --------------------------------------------------------------------------
# Parameter init + demo
# --------------------------------------------------------------------------

def init_params(key, channels, points):
    D = channels

    def w(k, shape, scale=0.1):
        return scale * jax.random.normal(k, shape, dtype=jnp.float32)

    def gnn_params(k0):
        kk = jax.random.split(k0, 7)
        return {
            "w_qkv": w(kk[0], (3 * D, D)),
            "b_qkv": w(kk[1], (3 * D,)),
            "w_merge": w(kk[2], (D, D)),
            "b_merge": w(kk[3], (D,)),
            "w_mlp1": w(kk[4], (2 * D, 2 * D)),
            "b_mlp1": w(kk[5], (2 * D,)),
            "w_mlp2": w(kk[6], (D, 2 * D)),
            "b_mlp2": jnp.zeros((D,), jnp.float32),   # nn.init.constant_(.., 0)
        }

    k1, k2, k3, k4 = jax.random.split(key, 4)
    return {
        "gnn1": gnn_params(k1),
        "gnn2": gnn_params(k2),
        "w_conv2": w(k3, (points, points)),
        "b_conv2": w(k4, (points,)),
    }


if __name__ == "__main__":
    key = jax.random.PRNGKey(0)
    B, C, P = 2, 32, 128      # batch=2, channels=32 (4 heads x 8), points=128
    kx, kp = jax.random.split(key)
    x = jax.random.normal(kx, (B, C, P, 1), dtype=jnp.float32)
    params = init_params(kp, C, P)

    fwd = jax.jit(oafilter_gnn_forward)
    y = jax.block_until_ready(fwd(x, params))

    assert y.shape == (B, C, P, 1), y.shape
    assert bool(jnp.all(jnp.isfinite(y)))
    print("KERNEL_OK")
</pallas_src>

<mosaic_0001>
module attributes {stable_mosaic.version = 11 : i64} {
  func.func @_inorm_qkv_kernel(%arg0: i32, %arg1: memref<1x32x128xf32, #tpu.memory_space<vmem>>, %arg2: memref<96x32xf32, #tpu.memory_space<vmem>>, %arg3: memref<96x1xf32, #tpu.memory_space<vmem>>, %arg4: memref<1x32x128xf32, #tpu.memory_space<vmem>>, %arg5: memref<1x96x128xf32, #tpu.memory_space<vmem>>) attributes {dimension_semantics = [#tpu.dimension_semantics<parallel>], iteration_bounds = array<i64: 2>, scalar_prefetch = 0 : i64, scratch_operands = 0 : i64, tpu.core_type = #tpu.core_type<tc>, window_params = [{transform_indices = @transform_0, window_bounds = array<i64: 1, 32, 128>}, {pipeline_mode = #tpu.pipeline_mode<synchronous>, transform_indices = @transform_1, window_bounds = array<i64: 96, 32>}, {pipeline_mode = #tpu.pipeline_mode<synchronous>, transform_indices = @transform_2, window_bounds = array<i64: 96, 1>}, {transform_indices = @transform_3, window_bounds = array<i64: 1, 32, 128>}, {transform_indices = @transform_4, window_bounds = array<i64: 1, 96, 128>}]} {
    %c0 = arith.constant 0 : index
    %c0_0 = arith.constant 0 : index
    %c0_1 = arith.constant 0 : index
    %0 = vector.load %arg1[%c0, %c0_0, %c0_1] : memref<1x32x128xf32, #tpu.memory_space<vmem>>, vector<1x32x128xf32>
    %1 = vector.shape_cast %0 : vector<1x32x128xf32> to vector<32x128xf32>
    %cst = arith.constant dense<0.000000e+00> : vector<32xf32>
    %2 = vector.multi_reduction <add>, %1, %cst [1] : vector<32x128xf32> to vector<32xf32>
    %3 = vector.shape_cast %2 : vector<32xf32> to vector<32x1xf32>
    %cst_2 = arith.constant 1.280000e+02 : f32
    %4 = vector.broadcast %cst_2 : f32 to vector<32x1xf32>
    %5 = arith.divf %3, %4 : vector<32x1xf32>
    %6 = vector.broadcast %5 : vector<32x1xf32> to vector<32x128xf32>
    %7 = arith.subf %1, %6 : vector<32x128xf32>
    %8 = arith.mulf %7, %7 : vector<32x128xf32>
    %cst_3 = arith.constant dense<0.000000e+00> : vector<32xf32>
    %9 = vector.multi_reduction <add>, %8, %cst_3 [1] : vector<32x128xf32> to vector<32xf32>
    %10 = vector.shape_cast %9 : vector<32xf32> to vector<32x1xf32>
    %cst_4 = arith.constant 1.280000e+02 : f32
    %11 = vector.broadcast %cst_4 : f32 to vector<32x1xf32>
    %12 = arith.divf %10, %11 : vector<32x1xf32>
    %cst_5 = arith.constant 1.000000e-03 : f32
    %13 = vector.broadcast %cst_5 : f32 to vector<32x1xf32>
    %14 = arith.addf %12, %13 : vector<32x1xf32>
    %15 = math.rsqrt %14 : vector<32x1xf32>
    %16 = vector.broadcast %15 : vector<32x1xf32> to vector<32x128xf32>
    %17 = arith.mulf %7, %16 : vector<32x128xf32>
    %c0_6 = arith.constant 0 : index
    %c0_7 = arith.constant 0 : index
    %c0_8 = arith.constant 0 : index
    %18 = vector.load %arg4[%c0_6, %c0_7, %c0_8] : memref<1x32x128xf32, #tpu.memory_space<vmem>>, vector<1x32x128xf32>
    %19 = vector.shape_cast %18 : vector<1x32x128xf32> to vector<32x128xf32>
    %20 = vector.shape_cast %17 : vector<32x128xf32> to vector<1x32x128xf32>
    tpu.vector_store %arg4[%c0_6, %c0_7, %c0_8], %20 {strides = array<i32>} : memref<1x32x128xf32, #tpu.memory_space<vmem>>, vector<1x32x128xf32>,
    %c0_9 = arith.constant 0 : index
    %c0_10 = arith.constant 0 : index
    %21 = vector.load %arg2[%c0_9, %c0_10] : memref<96x32xf32, #tpu.memory_space<vmem>>, vector<96x32xf32>
    %cst_11 = arith.constant dense<0.000000e+00> : vector<96x128xf32>
    %22 = tpu.matmul %21, %17, %cst_11 {dimension_numbers = #tpu.dot_dimension_numbers<[1], [0], [0], [1], [0, 0, 1, 1], [], []>} : vector<96x32xf32>, vector<32x128xf32>, vector<96x128xf32> -> vector<96x128xf32>
    %c0_12 = arith.constant 0 : index
    %c0_13 = arith.constant 0 : index
    %23 = vector.load %arg3[%c0_12, %c0_13] : memref<96x1xf32, #tpu.memory_space<vmem>>, vector<96x1xf32>
    %24 = vector.broadcast %23 : vector<96x1xf32> to vector<96x128xf32>
    %25 = arith.addf %22, %24 : vector<96x128xf32>
    %c0_14 = arith.constant 0 : index
    %c0_15 = arith.constant 0 : index
    %c0_16 = arith.constant 0 : index
    %26 = vector.load %arg5[%c0_14, %c0_15, %c0_16] : memref<1x96x128xf32, #tpu.memory_space<vmem>>, vector<1x96x128xf32>
    %27 = vector.shape_cast %26 : vector<1x96x128xf32> to vector<96x128xf32>
    %28 = vector.shape_cast %25 : vector<96x128xf32> to vector<1x96x128xf32>
    tpu.vector_store %arg5[%c0_14, %c0_15, %c0_16], %28 {strides = array<i32>} : memref<1x96x128xf32, #tpu.memory_space<vmem>>, vector<1x96x128xf32>,
    return
  }
  func.func @transform_0(%arg0: i32) -> (i32, i32, i32) {
    %c0_i32 = arith.constant 0 : i32
    %c0_i32_0 = arith.constant 0 : i32
    %c0_i32_1 = arith.constant 0 : i32
    return %arg0, %c0_i32, %c0_i32_0 : i32, i32, i32
  }
  func.func @transform_1(%arg0: i32) -> (i32, i32) {
    %c0_i32 = arith.constant 0 : i32
    %c0_i32_0 = arith.constant 0 : i32
    %c0_i32_1 = arith.constant 0 : i32
    return %c0_i32, %c0_i32_0 : i32, i32
  }
  func.func @transform_2(%arg0: i32) -> (i32, i32) {
    %c0_i32 = arith.constant 0 : i32
    %c0_i32_0 = arith.constant 0 : i32
    %c0_i32_1 = arith.constant 0 : i32
    return %c0_i32, %c0_i32_0 : i32, i32
  }
  func.func @transform_3(%arg0: i32) -> (i32, i32, i32) {
    %c0_i32 = arith.constant 0 : i32
    %c0_i32_0 = arith.constant 0 : i32
    %c0_i32_1 = arith.constant 0 : i32
    return %arg0, %c0_i32, %c0_i32_0 : i32, i32, i32
  }
  func.func @transform_4(%arg0: i32) -> (i32, i32, i32) {
    %c0_i32 = arith.constant 0 : i32
    %c0_i32_0 = arith.constant 0 : i32
    %c0_i32_1 = arith.constant 0 : i32
    return %arg0, %c0_i32, %c0_i32_0 : i32, i32, i32
  }
}

module attributes {stable_mosaic.version = 11 : i64} {
  func.func @_attn_kernel(%arg0: i32, %arg1: memref<1x128x8xf32, #tpu.memory_space<vmem>>, %arg2: memref<1x8x128xf32, #tpu.memory_space<vmem>>, %arg3: memref<1x128x8xf32, #tpu.memory_space<vmem>>, %arg4: memref<1x128x8xf32, #tpu.memory_space<vmem>>) attributes {dimension_semantics = [#tpu.dimension_semantics<parallel>], iteration_bounds = array<i64: 8>, scalar_prefetch = 0 : i64, scratch_operands = 0 : i64, tpu.core_type = #tpu.core_type<tc>, window_params = [{transform_indices = @transform_0, window_bounds = array<i64: 1, 128, 8>}, {transform_indices = @transform_1, window_bounds = array<i64: 1, 8, 128>}, {transform_indices = @transform_2, window_bounds = array<i64: 1, 128, 8>}, {transform_indices = @transform_3, window_bounds = array<i64: 1, 128, 8>}]} {
    %c0 = arith.constant 0 : index
    %c0_0 = arith.constant 0 : index
    %c0_1 = arith.constant 0 : index
    %0 = vector.load %arg1[%c0, %c0_0, %c0_1] : memref<1x128x8xf32, #tpu.memory_space<vmem>>, vector<1x128x8xf32>
    %1 = vector.shape_cast %0 : vector<1x128x8xf32> to vector<128x8xf32>
    %c0_2 = arith.constant 0 : index
    %c0_3 = arith.constant 0 : index
    %c0_4 = arith.constant 0 : index
    %2 = vector.load %arg2[%c0_2, %c0_3, %c0_4] : memref<1x8x128xf32, #tpu.memory_space<vmem>>, vector<1x8x128xf32>
    %3 = vector.shape_cast %2 : vector<1x8x128xf32> to vector<8x128xf32>
    %c0_5 = arith.constant 0 : index
    %c0_6 = arith.constant 0 : index
    %c0_7 = arith.constant 0 : index
    %4 = vector.load %arg3[%c0_5, %c0_6, %c0_7] : memref<1x128x8xf32, #tpu.memory_space<vmem>>, vector<1x128x8xf32>
    %5 = vector.shape_cast %4 : vector<1x128x8xf32> to vector<128x8xf32>
    %cst = arith.constant dense<0.000000e+00> : vector<128x128xf32>
    %6 = tpu.matmul %1, %3, %cst {dimension_numbers = #tpu.dot_dimension_numbers<[1], [0], [0], [1], [0, 0, 1, 1], [], []>} : vector<128x8xf32>, vector<8x128xf32>, vector<128x128xf32> -> vector<128x128xf32>
    %cst_8 = arith.constant 0.353553385 : f32
    %7 = vector.broadcast %cst_8 : f32 to vector<128x128xf32>
    %8 = arith.mulf %6, %7 : vector<128x128xf32>
    %cst_9 = arith.constant dense<0xFF800000> : vector<128xf32>
    %9 = vector.multi_reduction <maximumf>, %8, %cst_9 [1] : vector<128x128xf32> to vector<128xf32>
    %10 = vector.shape_cast %9 : vector<128xf32> to vector<128x1xf32>
    %11 = vector.broadcast %10 : vector<128x1xf32> to vector<128x128xf32>
    %12 = arith.subf %8, %11 : vector<128x128xf32>
    %13 = math.exp %12 : vector<128x128xf32>
    %cst_10 = arith.constant dense<0.000000e+00> : vector<128xf32>
    %14 = vector.multi_reduction <add>, %13, %cst_10 [1] : vector<128x128xf32> to vector<128xf32>
    %15 = vector.shape_cast %14 : vector<128xf32> to vector<128x1xf32>
    %16 = tpu.reciprocal %15 {approx = true} : vector<128x1xf32> -> vector<128x1xf32>
    %17 = vector.broadcast %16 : vector<128x1xf32> to vector<128x128xf32>
    %18 = arith.mulf %13, %17 : vector<128x128xf32>
    %cst_11 = arith.constant dense<0.000000e+00> : vector<128x8xf32>
    %19 = tpu.matmul %18, %5, %cst_11 {dimension_numbers = #tpu.dot_dimension_numbers<[1], [0], [0], [1], [0, 0, 1, 1], [], []>} : vector<128x128xf32>, vector<128x8xf32>, vector<128x8xf32> -> vector<128x8xf32>
    %c0_12 = arith.constant 0 : index
    %c0_13 = arith.constant 0 : index
    %c0_14 = arith.constant 0 : index
    %20 = vector.load %arg4[%c0_12, %c0_13, %c0_14] : memref<1x128x8xf32, #tpu.memory_space<vmem>>, vector<1x128x8xf32>
    %21 = vector.shape_cast %20 : vector<1x128x8xf32> to vector<128x8xf32>
    %22 = vector.shape_cast %19 : vector<128x8xf32> to vector<1x128x8xf32>
    tpu.vector_store %arg4[%c0_12, %c0_13, %c0_14], %22 {strides = array<i32>} : memref<1x128x8xf32, #tpu.memory_space<vmem>>, vector<1x128x8xf32>,
    return
  }
  func.func @transform_0(%arg0: i32) -> (i32, i32, i32) {
    %c0_i32 = arith.constant 0 : i32
    %c0_i32_0 = arith.constant 0 : i32
    %c0_i32_1 = arith.constant 0 : i32
    return %arg0, %c0_i32, %c0_i32_0 : i32, i32, i32
  }
  func.func @transform_1(%arg0: i32) -> (i32, i32, i32) {
    %c0_i32 = arith.constant 0 : i32
    %c0_i32_0 = arith.constant 0 : i32
    %c0_i32_1 = arith.constant 0 : i32
    return %arg0, %c0_i32, %c0_i32_0 : i32, i32, i32
  }
  func.func @transform_2(%arg0: i32) -> (i32, i32, i32) {
    %c0_i32 = arith.constant 0 : i32
    %c0_i32_0 = arith.constant 0 : i32
    %c0_i32_1 = arith.constant 0 : i32
    return %arg0, %c0_i32, %c0_i32_0 : i32, i32, i32
  }
  func.func @transform_3(%arg0: i32) -> (i32, i32, i32) {
    %c0_i32 = arith.constant 0 : i32
    %c0_i32_0 = arith.constant 0 : i32
    %c0_i32_1 = arith.constant 0 : i32
    return %arg0, %c0_i32, %c0_i32_0 : i32, i32, i32
  }
}

module attributes {stable_mosaic.version = 11 : i64} {
  func.func @_conv1x1_kernel(%arg0: i32, %arg1: memref<1x32x128xf32, #tpu.memory_space<vmem>>, %arg2: memref<32x32xf32, #tpu.memory_space<vmem>>, %arg3: memref<32x1xf32, #tpu.memory_space<vmem>>, %arg4: memref<1x32x128xf32, #tpu.memory_space<vmem>>) attributes {dimension_semantics = [#tpu.dimension_semantics<parallel>], iteration_bounds = array<i64: 2>, scalar_prefetch = 0 : i64, scratch_operands = 0 : i64, tpu.core_type = #tpu.core_type<tc>, window_params = [{transform_indices = @transform_0, window_bounds = array<i64: 1, 32, 128>}, {pipeline_mode = #tpu.pipeline_mode<synchronous>, transform_indices = @transform_1, window_bounds = array<i64: 32, 32>}, {pipeline_mode = #tpu.pipeline_mode<synchronous>, transform_indices = @transform_2, window_bounds = array<i64: 32, 1>}, {transform_indices = @transform_3, window_bounds = array<i64: 1, 32, 128>}]} {
    %c0 = arith.constant 0 : index
    %c0_0 = arith.constant 0 : index
    %0 = vector.load %arg2[%c0, %c0_0] : memref<32x32xf32, #tpu.memory_space<vmem>>, vector<32x32xf32>
    %c0_1 = arith.constant 0 : index
    %c0_2 = arith.constant 0 : index
    %c0_3 = arith.constant 0 : index
    %1 = vector.load %arg1[%c0_1, %c0_2, %c0_3] : memref<1x32x128xf32, #tpu.memory_space<vmem>>, vector<1x32x128xf32>
    %2 = vector.shape_cast %1 : vector<1x32x128xf32> to vector<32x128xf32>
    %cst = arith.constant dense<0.000000e+00> : vector<32x128xf32>
    %3 = tpu.matmul %0, %2, %cst {dimension_numbers = #tpu.dot_dimension_numbers<[1], [0], [0], [1], [0, 0, 1, 1], [], []>} : vector<32x32xf32>, vector<32x128xf32>, vector<32x128xf32> -> vector<32x128xf32>
    %c0_4 = arith.constant 0 : index
    %c0_5 = arith.constant 0 : index
    %4 = vector.load %arg3[%c0_4, %c0_5] : memref<32x1xf32, #tpu.memory_space<vmem>>, vector<32x1xf32>
    %5 = vector.broadcast %4 : vector<32x1xf32> to vector<32x128xf32>
    %6 = arith.addf %3, %5 : vector<32x128xf32>
    %c0_6 = arith.constant 0 : index
    %c0_7 = arith.constant 0 : index
    %c0_8 = arith.constant 0 : index
    %7 = vector.load %arg4[%c0_6, %c0_7, %c0_8] : memref<1x32x128xf32, #tpu.memory_space<vmem>>, vector<1x32x128xf32>
    %8 = vector.shape_cast %7 : vector<1x32x128xf32> to vector<32x128xf32>
    %9 = vector.shape_cast %6 : vector<32x128xf32> to vector<1x32x128xf32>
    tpu.vector_store %arg4[%c0_6, %c0_7, %c0_8], %9 {strides = array<i32>} : memref<1x32x128xf32, #tpu.memory_space<vmem>>, vector<1x32x128xf32>,
    return
  }
  func.func @transform_0(%arg0: i32) -> (i32, i32, i32) {
    %c0_i32 = arith.constant 0 : i32
    %c0_i32_0 = arith.constant 0 : i32
    %c0_i32_1 = arith.constant 0 : i32
    return %arg0, %c0_i32, %c0_i32_0 : i32, i32, i32
  }
  func.func @transform_1(%arg0: i32) -> (i32, i32) {
    %c0_i32 = arith.constant 0 : i32
    %c0_i32_0 = arith.constant 0 : i32
    %c0_i32_1 = arith.constant 0 : i32
    return %c0_i32, %c0_i32_0 : i32, i32
  }
  func.func @transform_2(%arg0: i32) -> (i32, i32) {
    %c0_i32 = arith.constant 0 : i32
    %c0_i32_0 = arith.constant 0 : i32
    %c0_i32_1 = arith.constant 0 : i32
    return %c0_i32, %c0_i32_0 : i32, i32
  }
  func.func @transform_3(%arg0: i32) -> (i32, i32, i32) {
    %c0_i32 = arith.constant 0 : i32
    %c0_i32_0 = arith.constant 0 : i32
    %c0_i32_1 = arith.constant 0 : i32
    return %arg0, %c0_i32, %c0_i32_0 : i32, i32, i32
  }
}

module attributes {stable_mosaic.version = 11 : i64} {
  func.func @_conv1x1_kernel(%arg0: i32, %arg1: memref<1x64x128xf32, #tpu.memory_space<vmem>>, %arg2: memref<64x64xf32, #tpu.memory_space<vmem>>, %arg3: memref<64x1xf32, #tpu.memory_space<vmem>>, %arg4: memref<1x64x128xf32, #tpu.memory_space<vmem>>) attributes {dimension_semantics = [#tpu.dimension_semantics<parallel>], iteration_bounds = array<i64: 2>, scalar_prefetch = 0 : i64, scratch_operands = 0 : i64, tpu.core_type = #tpu.core_type<tc>, window_params = [{transform_indices = @transform_0, window_bounds = array<i64: 1, 64, 128>}, {pipeline_mode = #tpu.pipeline_mode<synchronous>, transform_indices = @transform_1, window_bounds = array<i64: 64, 64>}, {pipeline_mode = #tpu.pipeline_mode<synchronous>, transform_indices = @transform_2, window_bounds = array<i64: 64, 1>}, {transform_indices = @transform_3, window_bounds = array<i64: 1, 64, 128>}]} {
    %c0 = arith.constant 0 : index
    %c0_0 = arith.constant 0 : index
    %0 = vector.load %arg2[%c0, %c0_0] : memref<64x64xf32, #tpu.memory_space<vmem>>, vector<64x64xf32>
    %c0_1 = arith.constant 0 : index
    %c0_2 = arith.constant 0 : index
    %c0_3 = arith.constant 0 : index
    %1 = vector.load %arg1[%c0_1, %c0_2, %c0_3] : memref<1x64x128xf32, #tpu.memory_space<vmem>>, vector<1x64x128xf32>
    %2 = vector.shape_cast %1 : vector<1x64x128xf32> to vector<64x128xf32>
    %cst = arith.constant dense<0.000000e+00> : vector<64x128xf32>
    %3 = tpu.matmul %0, %2, %cst {dimension_numbers = #tpu.dot_dimension_numbers<[1], [0], [0], [1], [0, 0, 1, 1], [], []>} : vector<64x64xf32>, vector<64x128xf32>, vector<64x128xf32> -> vector<64x128xf32>
    %c0_4 = arith.constant 0 : index
    %c0_5 = arith.constant 0 : index
    %4 = vector.load %arg3[%c0_4, %c0_5] : memref<64x1xf32, #tpu.memory_space<vmem>>, vector<64x1xf32>
    %5 = vector.broadcast %4 : vector<64x1xf32> to vector<64x128xf32>
    %6 = arith.addf %3, %5 : vector<64x128xf32>
    %c0_6 = arith.constant 0 : index
    %c0_7 = arith.constant 0 : index
    %c0_8 = arith.constant 0 : index
    %7 = vector.load %arg4[%c0_6, %c0_7, %c0_8] : memref<1x64x128xf32, #tpu.memory_space<vmem>>, vector<1x64x128xf32>
    %8 = vector.shape_cast %7 : vector<1x64x128xf32> to vector<64x128xf32>
    %9 = vector.shape_cast %6 : vector<64x128xf32> to vector<1x64x128xf32>
    tpu.vector_store %arg4[%c0_6, %c0_7, %c0_8], %9 {strides = array<i32>} : memref<1x64x128xf32, #tpu.memory_space<vmem>>, vector<1x64x128xf32>,
    return
  }
  func.func @transform_0(%arg0: i32) -> (i32, i32, i32) {
    %c0_i32 = arith.constant 0 : i32
    %c0_i32_0 = arith.constant 0 : i32
    %c0_i32_1 = arith.constant 0 : i32
    return %arg0, %c0_i32, %c0_i32_0 : i32, i32, i32
  }
  func.func @transform_1(%arg0: i32) -> (i32, i32) {
    %c0_i32 = arith.constant 0 : i32
    %c0_i32_0 = arith.constant 0 : i32
    %c0_i32_1 = arith.constant 0 : i32
    return %c0_i32, %c0_i32_0 : i32, i32
  }
  func.func @transform_2(%arg0: i32) -> (i32, i32) {
    %c0_i32 = arith.constant 0 : i32
    %c0_i32_0 = arith.constant 0 : i32
    %c0_i32_1 = arith.constant 0 : i32
    return %c0_i32, %c0_i32_0 : i32, i32
  }
  func.func @transform_3(%arg0: i32) -> (i32, i32, i32) {
    %c0_i32 = arith.constant 0 : i32
    %c0_i32_0 = arith.constant 0 : i32
    %c0_i32_1 = arith.constant 0 : i32
    return %arg0, %c0_i32, %c0_i32_0 : i32, i32, i32
  }
}

module attributes {stable_mosaic.version = 11 : i64} {
  func.func @_scale_relu_conv_kernel(%arg0: i32, %arg1: memref<1x64x128xf32, #tpu.memory_space<vmem>>, %arg2: memref<64x1xf32, #tpu.memory_space<vmem>>, %arg3: memref<64x1xf32, #tpu.memory_space<vmem>>, %arg4: memref<32x64xf32, #tpu.memory_space<vmem>>, %arg5: memref<32x1xf32, #tpu.memory_space<vmem>>, %arg6: memref<1x32x128xf32, #tpu.memory_space<vmem>>) attributes {dimension_semantics = [#tpu.dimension_semantics<parallel>], iteration_bounds = array<i64: 2>, scalar_prefetch = 0 : i64, scratch_operands = 0 : i64, tpu.core_type = #tpu.core_type<tc>, window_params = [{transform_indices = @transform_0, window_bounds = array<i64: 1, 64, 128>}, {pipeline_mode = #tpu.pipeline_mode<synchronous>, transform_indices = @transform_1, window_bounds = array<i64: 64, 1>}, {pipeline_mode = #tpu.pipeline_mode<synchronous>, transform_indices = @transform_2, window_bounds = array<i64: 64, 1>}, {pipeline_mode = #tpu.pipeline_mode<synchronous>, transform_indices = @transform_3, window_bounds = array<i64: 32, 64>}, {pipeline_mode = #tpu.pipeline_mode<synchronous>, transform_indices = @transform_4, window_bounds = array<i64: 32, 1>}, {transform_indices = @transform_5, window_bounds = array<i64: 1, 32, 128>}]} {
    %c0 = arith.constant 0 : index
    %c0_0 = arith.constant 0 : index
    %c0_1 = arith.constant 0 : index
    %0 = vector.load %arg1[%c0, %c0_0, %c0_1] : memref<1x64x128xf32, #tpu.memory_space<vmem>>, vector<1x64x128xf32>
    %1 = vector.shape_cast %0 : vector<1x64x128xf32> to vector<64x128xf32>
    %c0_2 = arith.constant 0 : index
    %c0_3 = arith.constant 0 : index
    %2 = vector.load %arg2[%c0_2, %c0_3] : memref<64x1xf32, #tpu.memory_space<vmem>>, vector<64x1xf32>
    %3 = vector.broadcast %2 : vector<64x1xf32> to vector<64x128xf32>
    %4 = arith.mulf %1, %3 : vector<64x128xf32>
    %c0_4 = arith.constant 0 : index
    %c0_5 = arith.constant 0 : index
    %5 = vector.load %arg3[%c0_4, %c0_5] : memref<64x1xf32, #tpu.memory_space<vmem>>, vector<64x1xf32>
    %6 = vector.broadcast %5 : vector<64x1xf32> to vector<64x128xf32>
    %7 = arith.addf %4, %6 : vector<64x128xf32>
    %cst = arith.constant 0.000000e+00 : f32
    %8 = vector.broadcast %cst : f32 to vector<64x128xf32>
    %9 = arith.maximumf %7, %8 : vector<64x128xf32>
    %c0_6 = arith.constant 0 : index
    %c0_7 = arith.constant 0 : index
    %10 = vector.load %arg4[%c0_6, %c0_7] : memref<32x64xf32, #tpu.memory_space<vmem>>, vector<32x64xf32>
    %cst_8 = arith.constant dense<0.000000e+00> : vector<32x128xf32>
    %11 = tpu.matmul %10, %9, %cst_8 {dimension_numbers = #tpu.dot_dimension_numbers<[1], [0], [0], [1], [0, 0, 1, 1], [], []>} : vector<32x64xf32>, vector<64x128xf32>, vector<32x128xf32> -> vector<32x128xf32>
    %c0_9 = arith.constant 0 : index
    %c0_10 = arith.constant 0 : index
    %12 = vector.load %arg5[%c0_9, %c0_10] : memref<32x1xf32, #tpu.memory_space<vmem>>, vector<32x1xf32>
    %13 = vector.broadcast %12 : vector<32x1xf32> to vector<32x128xf32>
    %14 = arith.addf %11, %13 : vector<32x128xf32>
    %c0_11 = arith.constant 0 : index
    %c0_12 = arith.constant 0 : index
    %c0_13 = arith.constant 0 : index
    %15 = vector.load %arg6[%c0_11, %c0_12, %c0_13] : memref<1x32x128xf32, #tpu.memory_space<vmem>>, vector<1x32x128xf32>
    %16 = vector.shape_cast %15 : vector<1x32x128xf32> to vector<32x128xf32>
    %17 = vector.shape_cast %14 : vector<32x128xf32> to vector<1x32x128xf32>
    tpu.vector_store %arg6[%c0_11, %c0_12, %c0_13], %17 {strides = array<i32>} : memref<1x32x128xf32, #tpu.memory_space<vmem>>, vector<1x32x128xf32>,
    return
  }
  func.func @transform_0(%arg0: i32) -> (i32, i32, i32) {
    %c0_i32 = arith.constant 0 : i32
    %c0_i32_0 = arith.constant 0 : i32
    %c0_i32_1 = arith.constant 0 : i32
    return %arg0, %c0_i32, %c0_i32_0 : i32, i32, i32
  }
  func.func @transform_1(%arg0: i32) -> (i32, i32) {
    %c0_i32 = arith.constant 0 : i32
    %c0_i32_0 = arith.constant 0 : i32
    %c0_i32_1 = arith.constant 0 : i32
    return %c0_i32, %c0_i32_0 : i32, i32
  }
  func.func @transform_2(%arg0: i32) -> (i32, i32) {
    %c0_i32 = arith.constant 0 : i32
    %c0_i32_0 = arith.constant 0 : i32
    %c0_i32_1 = arith.constant 0 : i32
    return %c0_i32, %c0_i32_0 : i32, i32
  }
  func.func @transform_3(%arg0: i32) -> (i32, i32) {
    %c0_i32 = arith.constant 0 : i32
    %c0_i32_0 = arith.constant 0 : i32
    %c0_i32_1 = arith.constant 0 : i32
    return %c0_i32, %c0_i32_0 : i32, i32
  }
  func.func @transform_4(%arg0: i32) -> (i32, i32) {
    %c0_i32 = arith.constant 0 : i32
    %c0_i32_0 = arith.constant 0 : i32
    %c0_i32_1 = arith.constant 0 : i32
    return %c0_i32, %c0_i32_0 : i32, i32
  }
  func.func @transform_5(%arg0: i32) -> (i32, i32, i32) {
    %c0_i32 = arith.constant 0 : i32
    %c0_i32_0 = arith.constant 0 : i32
    %c0_i32_1 = arith.constant 0 : i32
    return %arg0, %c0_i32, %c0_i32_0 : i32, i32, i32
  }
}

module attributes {stable_mosaic.version = 11 : i64} {
  func.func @_bnp_relu_rconv_res_kernel(%arg0: i32, %arg1: memref<1x32x128xf32, #tpu.memory_space<vmem>>, %arg2: memref<1x128xf32, #tpu.memory_space<vmem>>, %arg3: memref<1x128xf32, #tpu.memory_space<vmem>>, %arg4: memref<128x128xf32, #tpu.memory_space<vmem>>, %arg5: memref<1x128xf32, #tpu.memory_space<vmem>>, %arg6: memref<1x32x128xf32, #tpu.memory_space<vmem>>) attributes {dimension_semantics = [#tpu.dimension_semantics<parallel>], iteration_bounds = array<i64: 2>, scalar_prefetch = 0 : i64, scratch_operands = 0 : i64, tpu.core_type = #tpu.core_type<tc>, window_params = [{transform_indices = @transform_0, window_bounds = array<i64: 1, 32, 128>}, {pipeline_mode = #tpu.pipeline_mode<synchronous>, transform_indices = @transform_1, window_bounds = array<i64: 1, 128>}, {pipeline_mode = #tpu.pipeline_mode<synchronous>, transform_indices = @transform_2, window_bounds = array<i64: 1, 128>}, {pipeline_mode = #tpu.pipeline_mode<synchronous>, transform_indices = @transform_3, window_bounds = array<i64: 128, 128>}, {pipeline_mode = #tpu.pipeline_mode<synchronous>, transform_indices = @transform_4, window_bounds = array<i64: 1, 128>}, {transform_indices = @transform_5, window_bounds = array<i64: 1, 32, 128>}]} {
    %c0 = arith.constant 0 : index
    %c0_0 = arith.constant 0 : index
    %c0_1 = arith.constant 0 : index
    %0 = vector.load %arg1[%c0, %c0_0, %c0_1] : memref<1x32x128xf32, #tpu.memory_space<vmem>>, vector<1x32x128xf32>
    %1 = vector.shape_cast %0 : vector<1x32x128xf32> to vector<32x128xf32>
    %c0_2 = arith.constant 0 : index
    %c0_3 = arith.constant 0 : index
    %2 = vector.load %arg2[%c0_2, %c0_3] : memref<1x128xf32, #tpu.memory_space<vmem>>, vector<1x128xf32>
    %3 = vector.broadcast %2 : vector<1x128xf32> to vector<32x128xf32>
    %4 = arith.mulf %1, %3 : vector<32x128xf32>
    %c0_4 = arith.constant 0 : index
    %c0_5 = arith.constant 0 : index
    %5 = vector.load %arg3[%c0_4, %c0_5] : memref<1x128xf32, #tpu.memory_space<vmem>>, vector<1x128xf32>
    %6 = vector.broadcast %5 : vector<1x128xf32> to vector<32x128xf32>
    %7 = arith.addf %4, %6 : vector<32x128xf32>
    %cst = arith.constant 0.000000e+00 : f32
    %8 = vector.broadcast %cst : f32 to vector<32x128xf32>
    %9 = arith.maximumf %7, %8 : vector<32x128xf32>
    %c0_6 = arith.constant 0 : index
    %c0_7 = arith.constant 0 : index
    %10 = vector.load %arg4[%c0_6, %c0_7] : memref<128x128xf32, #tpu.memory_space<vmem>>, vector<128x128xf32>
    %cst_8 = arith.constant dense<0.000000e+00> : vector<32x128xf32>
    %11 = tpu.matmul %9, %10, %cst_8 {dimension_numbers = #tpu.dot_dimension_numbers<[1], [0], [0], [1], [0, 0, 1, 1], [], []>} : vector<32x128xf32>, vector<128x128xf32>, vector<32x128xf32> -> vector<32x128xf32>
    %c0_9 = arith.constant 0 : index
    %c0_10 = arith.constant 0 : index
    %12 = vector.load %arg5[%c0_9, %c0_10] : memref<1x128xf32, #tpu.memory_space<vmem>>, vector<1x128xf32>
    %13 = vector.broadcast %12 : vector<1x128xf32> to vector<32x128xf32>
    %14 = arith.addf %11, %13 : vector<32x128xf32>
    %15 = arith.addf %1, %14 : vector<32x128xf32>
    %c0_11 = arith.constant 0 : index
    %c0_12 = arith.constant 0 : index
    %c0_13 = arith.constant 0 : index
    %16 = vector.load %arg6[%c0_11, %c0_12, %c0_13] : memref<1x32x128xf32, #tpu.memory_space<vmem>>, vector<1x32x128xf32>
    %17 = vector.shape_cast %16 : vector<1x32x128xf32> to vector<32x128xf32>
    %18 = vector.shape_cast %15 : vector<32x128xf32> to vector<1x32x128xf32>
    tpu.vector_store %arg6[%c0_11, %c0_12, %c0_13], %18 {strides = array<i32>} : memref<1x32x128xf32, #tpu.memory_space<vmem>>, vector<1x32x128xf32>,
    return
  }
  func.func @transform_0(%arg0: i32) -> (i32, i32, i32) {
    %c0_i32 = arith.constant 0 : i32
    %c0_i32_0 = arith.constant 0 : i32
    %c0_i32_1 = arith.constant 0 : i32
    return %arg0, %c0_i32, %c0_i32_0 : i32, i32, i32
  }
  func.func @transform_1(%arg0: i32) -> (i32, i32) {
    %c0_i32 = arith.constant 0 : i32
    %c0_i32_0 = arith.constant 0 : i32
    %c0_i32_1 = arith.constant 0 : i32
    return %c0_i32, %c0_i32_0 : i32, i32
  }
  func.func @transform_2(%arg0: i32) -> (i32, i32) {
    %c0_i32 = arith.constant 0 : i32
    %c0_i32_0 = arith.constant 0 : i32
    %c0_i32_1 = arith.constant 0 : i32
    return %c0_i32, %c0_i32_0 : i32, i32
  }
  func.func @transform_3(%arg0: i32) -> (i32, i32) {
    %c0_i32 = arith.constant 0 : i32
    %c0_i32_0 = arith.constant 0 : i32
    %c0_i32_1 = arith.constant 0 : i32
    return %c0_i32, %c0_i32_0 : i32, i32
  }
  func.func @transform_4(%arg0: i32) -> (i32, i32) {
    %c0_i32 = arith.constant 0 : i32
    %c0_i32_0 = arith.constant 0 : i32
    %c0_i32_1 = arith.constant 0 : i32
    return %c0_i32, %c0_i32_0 : i32, i32
  }
  func.func @transform_5(%arg0: i32) -> (i32, i32, i32) {
    %c0_i32 = arith.constant 0 : i32
    %c0_i32_0 = arith.constant 0 : i32
    %c0_i32_1 = arith.constant 0 : i32
    return %arg0, %c0_i32, %c0_i32_0 : i32, i32, i32
  }
}

module attributes {stable_mosaic.version = 11 : i64} {
  func.func @_scale_relu_conv_res_kernel(%arg0: i32, %arg1: memref<1x64x128xf32, #tpu.memory_space<vmem>>, %arg2: memref<64x1xf32, #tpu.memory_space<vmem>>, %arg3: memref<64x1xf32, #tpu.memory_space<vmem>>, %arg4: memref<32x64xf32, #tpu.memory_space<vmem>>, %arg5: memref<32x1xf32, #tpu.memory_space<vmem>>, %arg6: memref<1x32x128xf32, #tpu.memory_space<vmem>>, %arg7: memref<1x32x128xf32, #tpu.memory_space<vmem>>) attributes {dimension_semantics = [#tpu.dimension_semantics<parallel>], iteration_bounds = array<i64: 2>, scalar_prefetch = 0 : i64, scratch_operands = 0 : i64, tpu.core_type = #tpu.core_type<tc>, window_params = [{transform_indices = @transform_0, window_bounds = array<i64: 1, 64, 128>}, {pipeline_mode = #tpu.pipeline_mode<synchronous>, transform_indices = @transform_1, window_bounds = array<i64: 64, 1>}, {pipeline_mode = #tpu.pipeline_mode<synchronous>, transform_indices = @transform_2, window_bounds = array<i64: 64, 1>}, {pipeline_mode = #tpu.pipeline_mode<synchronous>, transform_indices = @transform_3, window_bounds = array<i64: 32, 64>}, {pipeline_mode = #tpu.pipeline_mode<synchronous>, transform_indices = @transform_4, window_bounds = array<i64: 32, 1>}, {transform_indices = @transform_5, window_bounds = array<i64: 1, 32, 128>}, {transform_indices = @transform_6, window_bounds = array<i64: 1, 32, 128>}]} {
    %c0 = arith.constant 0 : index
    %c0_0 = arith.constant 0 : index
    %c0_1 = arith.constant 0 : index
    %0 = vector.load %arg1[%c0, %c0_0, %c0_1] : memref<1x64x128xf32, #tpu.memory_space<vmem>>, vector<1x64x128xf32>
    %1 = vector.shape_cast %0 : vector<1x64x128xf32> to vector<64x128xf32>
    %c0_2 = arith.constant 0 : index
    %c0_3 = arith.constant 0 : index
    %2 = vector.load %arg2[%c0_2, %c0_3] : memref<64x1xf32, #tpu.memory_space<vmem>>, vector<64x1xf32>
    %3 = vector.broadcast %2 : vector<64x1xf32> to vector<64x128xf32>
    %4 = arith.mulf %1, %3 : vector<64x128xf32>
    %c0_4 = arith.constant 0 : index
    %c0_5 = arith.constant 0 : index
    %5 = vector.load %arg3[%c0_4, %c0_5] : memref<64x1xf32, #tpu.memory_space<vmem>>, vector<64x1xf32>
    %6 = vector.broadcast %5 : vector<64x1xf32> to vector<64x128xf32>
    %7 = arith.addf %4, %6 : vector<64x128xf32>
    %cst = arith.constant 0.000000e+00 : f32
    %8 = vector.broadcast %cst : f32 to vector<64x128xf32>
    %9 = arith.maximumf %7, %8 : vector<64x128xf32>
    %c0_6 = arith.constant 0 : index
    %c0_7 = arith.constant 0 : index
    %10 = vector.load %arg4[%c0_6, %c0_7] : memref<32x64xf32, #tpu.memory_space<vmem>>, vector<32x64xf32>
    %cst_8 = arith.constant dense<0.000000e+00> : vector<32x128xf32>
    %11 = tpu.matmul %10, %9, %cst_8 {dimension_numbers = #tpu.dot_dimension_numbers<[1], [0], [0], [1], [0, 0, 1, 1], [], []>} : vector<32x64xf32>, vector<64x128xf32>, vector<32x128xf32> -> vector<32x128xf32>
    %c0_9 = arith.constant 0 : index
    %c0_10 = arith.constant 0 : index
    %12 = vector.load %arg5[%c0_9, %c0_10] : memref<32x1xf32, #tpu.memory_space<vmem>>, vector<32x1xf32>
    %13 = vector.broadcast %12 : vector<32x1xf32> to vector<32x128xf32>
    %14 = arith.addf %11, %13 : vector<32x128xf32>
    %c0_11 = arith.constant 0 : index
    %c0_12 = arith.constant 0 : index
    %c0_13 = arith.constant 0 : index
    %15 = vector.load %arg6[%c0_11, %c0_12, %c0_13] : memref<1x32x128xf32, #tpu.memory_space<vmem>>, vector<1x32x128xf32>
    %16 = vector.shape_cast %15 : vector<1x32x128xf32> to vector<32x128xf32>
    %17 = arith.addf %14, %16 : vector<32x128xf32>
    %c0_14 = arith.constant 0 : index
    %c0_15 = arith.constant 0 : index
    %c0_16 = arith.constant 0 : index
    %18 = vector.load %arg7[%c0_14, %c0_15, %c0_16] : memref<1x32x128xf32, #tpu.memory_space<vmem>>, vector<1x32x128xf32>
    %19 = vector.shape_cast %18 : vector<1x32x128xf32> to vector<32x128xf32>
    %20 = vector.shape_cast %17 : vector<32x128xf32> to vector<1x32x128xf32>
    tpu.vector_store %arg7[%c0_14, %c0_15, %c0_16], %20 {strides = array<i32>} : memref<1x32x128xf32, #tpu.memory_space<vmem>>, vector<1x32x128xf32>,
    return
  }
  func.func @transform_0(%arg0: i32) -> (i32, i32, i32) {
    %c0_i32 = arith.constant 0 : i32
    %c0_i32_0 = arith.constant 0 : i32
    %c0_i32_1 = arith.constant 0 : i32
    return %arg0, %c0_i32, %c0_i32_0 : i32, i32, i32
  }
  func.func @transform_1(%arg0: i32) -> (i32, i32) {
    %c0_i32 = arith.constant 0 : i32
    %c0_i32_0 = arith.constant 0 : i32
    %c0_i32_1 = arith.constant 0 : i32
    return %c0_i32, %c0_i32_0 : i32, i32
  }
  func.func @transform_2(%arg0: i32) -> (i32, i32) {
    %c0_i32 = arith.constant 0 : i32
    %c0_i32_0 = arith.constant 0 : i32
    %c0_i32_1 = arith.constant 0 : i32
    return %c0_i32, %c0_i32_0 : i32, i32
  }
  func.func @transform_3(%arg0: i32) -> (i32, i32) {
    %c0_i32 = arith.constant 0 : i32
    %c0_i32_0 = arith.constant 0 : i32
    %c0_i32_1 = arith.constant 0 : i32
    return %c0_i32, %c0_i32_0 : i32, i32
  }
  func.func @transform_4(%arg0: i32) -> (i32, i32) {
    %c0_i32 = arith.constant 0 : i32
    %c0_i32_0 = arith.constant 0 : i32
    %c0_i32_1 = arith.constant 0 : i32
    return %c0_i32, %c0_i32_0 : i32, i32
  }
  func.func @transform_5(%arg0: i32) -> (i32, i32, i32) {
    %c0_i32 = arith.constant 0 : i32
    %c0_i32_0 = arith.constant 0 : i32
    %c0_i32_1 = arith.constant 0 : i32
    return %arg0, %c0_i32, %c0_i32_0 : i32, i32, i32
  }
  func.func @transform_6(%arg0: i32) -> (i32, i32, i32) {
    %c0_i32 = arith.constant 0 : i32
    %c0_i32_0 = arith.constant 0 : i32
    %c0_i32_1 = arith.constant 0 : i32
    return %arg0, %c0_i32, %c0_i32_0 : i32, i32, i32
  }
}

</mosaic_0001>

<bundles_post_ra>
// kernel: oafilter_gnn_forward.11
= control target key start
LH: loop header
LB: loop body
LE: loop exit
PB: predicated region body
PF: predicated region fallthrough
CT: control target
= control target key end

     0   :  { %s740_s15 = smov 0   ;;  %s886_s0 = inlined_call_operand.vmem [shape: f32[2,32,128], index: 0, kind: input, shape index: {}]   ;;  %s887_s1 = inlined_call_operand.vmem [shape: f32[96,32], index: 1, kind: input, shape index: {}]   ;;  %s888_s2 = inlined_call_operand.vmem [shape: f32[96,1], index: 2, kind: input, shape index: {}]   ;;  %s889_s3 = inlined_call_operand.vmem [shape: f32[2,32,128], index: 3, kind: output, shape index: {0}]   ;;  %s890_s4 = inlined_call_operand.vmem [shape: f32[2,96,128], index: 4, kind: output, shape index: {1}]  }
   0x1 LB: > { %s610_s16 = sadd.s32 4294967295, %s712_s15   ;;  %p614_p0 = scmp.ge.s32.totalorder %s712_s15, 1  ;;  %s712_s15 = sphi %s740_s15, %s15_s15  }
   0x2   : > { %p165_p1 = scmp.lt.s32.totalorder %s712_s15, 3 }
   0x4   : > { %p166_p2 = pnand %p614_p0, %p165_p1 }
   0x5   : > { %p196_p3 = scmp.lt.s32.totalorder (!%p166_p2), %s610_s16, 1 }
   0x6   : > { %169 = sbr.rel (%p166_p2) target bundleno = 534 (0x216), region = 32 }
   0xb   : > { %s892_s16 = smov (!%p196_p3, %s610_s16), 1  ;;  %v264_v20 = vld [vmem:[%s887_s1] sm:$0xff]  ;;  %vm348_vm0 = vcmask 261120   ;;  %v270_v21 = vld [vmem:[%s887_s1 + $0x30] sm:$0xff]  ;;  %v277_v22 = vld [vmem:[%s888_s2 + $0x8] sm:$0xff]  ;;  %v714_v23 = vmov 0  }
   0xc   : > { %s634_s17 = sshll.u32 %s892_s16, 5  ;;  %660 = vmatprep.mubr.msk.f32.mxu0 %vm348_vm0, %v264_v20  ;;  %669 = vmatprep.mubr.msk.f32.mxu1 %vm348_vm0, %v270_v21  ;;  %v278_v24 = vld [vmem:[%s888_s2 + $0x10] sm:$0xff]  ;;  %v276_v25 = vld [vmem:[%s888_s2] sm:$0xff]  ;;  %v285_v26 = vld [vmem:[%s888_s2 + $0x48] sm:$0xff]  ;;  %s686_s25 = smul.u32 96, %s892_s16 }
   0xd   : > { %s200_s20 = scalar_lea.vmem %s886_s0, %s634_s17  ;;  %697 = vset.pattern.permute.xlu1 %v714_v23  ;;  %696 = vset.pattern.permute.xlu0 %v714_v23  ;;  %v279_v27 = vld [vmem:[%s888_s2 + $0x18] sm:$0xff]  ;;  %v280_v29 = vld [vmem:[%s888_s2 + $0x20] sm:$0xff]  ;;  %v281_v30 = vld [vmem:[%s888_s2 + $0x28] sm:$0xff]  ;;  %s205_s28 = scalar_lea.vmem %s889_s3, %s634_s17 }
   0xe   : > { %v214_v0 = vld [vmem:[%s200_s20 + $0x18] sm:$0xff]  ;;  %v212_v1 = vld [vmem:[%s200_s20 + $0x8] sm:$0xff]  ;;  %v213_v2 = vld [vmem:[%s200_s20 + $0x10] sm:$0xff] }
   0xf   : > { %221 = vadd.xlane.f32.xlu0 %v214_v0  ;;  %217 = vadd.xlane.f32.xlu1 %v212_v1  ;;  %v211_v3 = vld [vmem:[%s200_s20] sm:$0xff]  ;;  %v287_v28 = vld [vmem:[%s888_s2 + $0x58] sm:$0xff]  ;;  %v282_v31 = vld [vmem:[%s888_s2 + $0x30] sm:$0xff] }
  0x10   : > { %v283_v32 = vld [vmem:[%s888_s2 + $0x38] sm:$0xff]  ;;  %v284_v33 = vld [vmem:[%s888_s2 + $0x40] sm:$0xff]  ;;  %v286_v34 = vld [vmem:[%s888_s2 + $0x50] sm:$0xff] }
  0x11   : > { %v265_v55 = vld [vmem:[%s887_s1 + $0x8] sm:$0xff]  ;;  %v271_v56 = vld [vmem:[%s887_s1 + $0x38] sm:$0xff]  ;;  %v266_v57 = vld [vmem:[%s887_s1 + $0x10] sm:$0xff] }
  0x12   : > { %v272_v58 = vld [vmem:[%s887_s1 + $0x40] sm:$0xff]  ;;  %v267_v59 = vld [vmem:[%s887_s1 + $0x18] sm:$0xff]  ;;  %v273_v60 = vld [vmem:[%s887_s1 + $0x48] sm:$0xff] }
  0x13   : > { %219 = vadd.xlane.f32.xlu0 %v213_v2  ;;  %215 = vadd.xlane.f32.xlu1 %v211_v3  ;;  %v268_v61 = vld [vmem:[%s887_s1 + $0x20] sm:$0xff]  ;;  %v274_v62 = vld [vmem:[%s887_s1 + $0x50] sm:$0xff]  ;;  %v269_v63 = vld [vmem:[%s887_s1 + $0x28] sm:$0xff] }
  0x98   : > { %v222_v4 = vpop.xlane.xlu0 %221  ;;  %v218_v5 = vpop.xlane.xlu1 %217 }
  0x99   : > { %v227_v6 = vmul.f32 0.0078125, %v222_v4  ;;  %v225_v7 = vmul.f32 0.0078125, %v218_v5 }
  0x9b   : > { %v756_v8 = vsub.f32 %v214_v0, %v227_v6  ;;  %v758_v9 = vsub.f32 %v212_v1, %v225_v7  ;;  %v275_v0 = vld [vmem:[%s887_s1 + $0x58] sm:$0xff] }
  0x9c   : > { %v220_v10 = vpop.xlane.xlu0 %219  ;;  %v216_v11 = vpop.xlane.xlu1 %215 }
  0x9d   : > { %v226_v12 = vmul.f32 0.0078125, %v220_v10  ;;  %v235_v13 = vmul.f32 %v756_v8, %v756_v8  ;;  %v224_v14 = vmul.f32 0.0078125, %v216_v11  ;;  %v233_v17 = vmul.f32 %v758_v9, %v758_v9 }
  0x9f   : > { %v762_v15 = vsub.f32 %v213_v2, %v226_v12  ;;  %242 = vadd.xlane.f32.xlu0 %v235_v13  ;;  %v764_v16 = vsub.f32 %v211_v3, %v224_v14 }
  0xa1   : > { %v234_v18 = vmul.f32 %v762_v15, %v762_v15  ;;  %v232_v19 = vmul.f32 %v764_v16, %v764_v16 }
  0xa3   : > { %238 = vadd.xlane.f32.xlu0 %v233_v17  ;;  %240 = vadd.xlane.f32.xlu1 %v234_v18 }
  0xa7   : > { %236 = vadd.xlane.f32.xlu1 %v232_v19 }
  0xb8   : > { %295 = vperm.xlu1 %697, %v277_v22  }
  0xb9   : > { %290 = vperm.xlu0 %696, %v276_v25  }
  0xbc   : > { %300 = vperm.xlu1 %697, %v278_v24  }
  0xbd   : > { %335 = vperm.xlu0 %696, %v285_v26  }
  0xc0   : > { %305 = vperm.xlu1 %697, %v279_v27  }
  0xc1   : > { %345 = vperm.xlu0 %696, %v287_v28  }
  0xc4   : > { %310 = vperm.xlu1 %697, %v280_v29  }
  0xc8   : > { %315 = vperm.xlu1 %697, %v281_v30  }
  0xcc   : > { %320 = vperm.xlu1 %697, %v282_v31  }
  0xd0   : > { %325 = vperm.xlu1 %697, %v283_v32  }
  0xd4   : > { %330 = vperm.xlu1 %697, %v284_v33  }
  0xd8   : > { %340 = vperm.xlu1 %697, %v286_v34  }
 0x128   : > { %v243_v35 = vpop.xlane.xlu0 %242 }
 0x129   : > { %v247_v36 = vmul.f32 0.0078125, %v243_v35 }
 0x12b   : > { %v251_v37 = vadd.f32 0.001, %v247_v36 }
 0x12c   : > { %v239_v38 = vpop.xlane.xlu0 %238  ;;  %v241_v39 = vpop.xlane.xlu1 %240 }
 0x12d   : > { %698 = vrsqrt.f32 %v251_v37  ;;  %v245_v40 = vmul.f32 0.0078125, %v239_v38  ;;  %v246_v41 = vmul.f32 0.0078125, %v241_v39 }
 0x12f   : > { %v249_v42 = vadd.f32 0.001, %v245_v40  ;;  %v250_v43 = vadd.f32 0.001, %v246_v41 }
 0x130   : > { %v237_v44 = vpop.xlane.xlu1 %236 }
 0x131   : > { %700 = vrsqrt.f32 %v249_v42  ;;  %v244_v45 = vmul.f32 0.0078125, %v237_v44 }
 0x132   : > { %702 = vrsqrt.f32 %v250_v43 }
 0x133   : > { %v248_v46 = vadd.f32 0.001, %v244_v45 }
 0x134   : > { %v296_v1 = vpop.permute.xlu1 %295  ;;  %v291_v7 = vpop.permute.xlu0 %290 }
 0x135   : > { %704 = vrsqrt.f32 %v248_v46 }
 0x138   : > { %v301_v2 = vpop.permute.xlu1 %300  ;;  %v336_v11 = vpop.permute.xlu0 %335 }
 0x13a   : > { %v699_v47 = vpop.eup %698 }
 0x13b   : > { %v259_v48 = vmul.f32 %v699_v47, %v756_v8 }
 0x13c   : > { %v306_v3 = vpop.permute.xlu1 %305  ;;  %v346_v25 = vpop.permute.xlu0 %345 }
 0x13d   : > { %263 = vst [vmem:[%s205_s28 + $0x18] sm:$0xff] %v259_v48  ;;  %652 = vmatprep.subr.mxu0 %v259_v48  ;;  %678 = vmatprep.subr.mxu1 %v259_v48 }
 0x13e   : > { %v701_v49 = vpop.eup %700  ;;  %653 = vmatpush3.msra.mxu0 %v259_v48  ;;  %682 = vmatpush3.msra.mxu1 %v259_v48 }
 0x13f   : > { %v703_v50 = vpop.eup %702  ;;  %v257_v51 = vmul.f32 %v701_v49, %v758_v9 }
 0x140   : > { %v258_v52 = vmul.f32 %v703_v50, %v762_v15  ;;  %v311_v4 = vpop.permute.xlu1 %310 }
 0x141   : > { %261 = vst [vmem:[%s205_s28 + $0x8] sm:$0xff] %v257_v51 }
 0x142   : > { %v705_v53 = vpop.eup %704  ;;  %262 = vst [vmem:[%s205_s28 + $0x10] sm:$0xff] %v258_v52  ;;  %654 = vmatprep.subr.mxu0 %v258_v52  ;;  %679 = vmatprep.subr.mxu1 %v258_v52 }
 0x143   : > { %655 = vmatpush3.msra.mxu0 %v258_v52  ;;  %683 = vmatpush3.msra.mxu1 %v258_v52  ;;  %v256_v54 = vmul.f32 %v705_v53, %v764_v16 }
 0x144   : > { %656 = vmatprep.subr.mxu0 %v257_v51  ;;  %680 = vmatprep.subr.mxu1 %v257_v51  ;;  %v316_v5 = vpop.permute.xlu1 %315 }
 0x145   : > { %657 = vmatpush3.msra.mxu0 %v257_v51  ;;  %684 = vmatpush3.msra.mxu1 %v257_v51  ;;  %260 = vst [vmem:[%s205_s28] sm:$0xff] %v256_v54  ;;  %s869_s28 = scalar_lea.vmem %s890_s4, %s686_s25 }
 0x146   : > { %658 = vmatprep.subr.mxu0 %v256_v54  ;;  %681 = vmatprep.subr.mxu1 %v256_v54 }
 0x147   : > { %659 = vmatpush3.msra.mxu0 %v256_v54  ;;  %685 = vmatpush3.msra.mxu1 %v256_v54 }
 0x148   : > { %661 = vmatmul.mubr.msk.f32.vlgmr.msra.gmra.mxu0 %vm348_vm0, %v265_v55  ;;  %670 = vmatmul.mubr.msk.f32.vlgmr.msra.gmra.mxu1 %vm348_vm0, %v271_v56  ;;  %v321_v6 = vpop.permute.xlu1 %320 }
 0x149   : > { %663 = vmatprep.mubr.msk.f32.mxu0 %vm348_vm0, %v266_v57  ;;  %672 = vmatprep.mubr.msk.f32.mxu1 %vm348_vm0, %v272_v58 }
 0x14c   : > { %664 = vmatmul.mubr.msk.f32.gmra.mxu0 %vm348_vm0, %v267_v59  ;;  %673 = vmatmul.mubr.msk.f32.gmra.mxu1 %vm348_vm0, %v273_v60  ;;  %v326_v8 = vpop.permute.xlu1 %325 }
 0x14d   : > { %666 = vmatprep.mubr.msk.f32.mxu0 %vm348_vm0, %v268_v61  ;;  %675 = vmatprep.mubr.msk.f32.mxu1 %vm348_vm0, %v274_v62 }
 0x150   : > { %667 = vmatmul.mubr.msk.f32.gmra.mxu0 %vm348_vm0, %v269_v63  ;;  %676 = vmatmul.mubr.msk.f32.gmra.mxu1 %vm348_vm0, %v275_v0  ;;  %v331_v16 = vpop.permute.xlu1 %330 }
 0x154   : > { %v341_v30 = vpop.permute.xlu1 %340 }
 0x208   : > { %v662_v9 = vpop.f32.mrf.mxu0  ;;  %v671_v10 = vpop.f32.mrf.mxu1 }
 0x209   : > { %v457_v12 = vadd.f32 %v662_v9, %v296_v1  ;;  %v487_v13 = vadd.f32 %v671_v10, %v326_v8 }
 0x20a   : > { %v451_v14 = vpop.f32.mrf.mxu0  ;;  %v481_v15 = vpop.f32.mrf.mxu1 }
 0x20b   : > { %511 = vst [vmem:[%s869_s28 + $0x8] sm:$0xff] %v457_v12  ;;  %517 = vst [vmem:[%s869_s28 + $0x38] sm:$0xff] %v487_v13  ;;  %v452_v17 = vadd.f32 %v451_v14, %v291_v7  ;;  %v482_v18 = vadd.f32 %v481_v15, %v321_v6 }
 0x20c   : > { %v665_v19 = vpop.f32.mrf.mxu0  ;;  %v674_v20 = vpop.f32.mrf.mxu1 }
 0x20d   : > { %510 = vst [vmem:[%s869_s28] sm:$0xff] %v452_v17  ;;  %516 = vst [vmem:[%s869_s28 + $0x30] sm:$0xff] %v482_v18  ;;  %v467_v21 = vadd.f32 %v665_v19, %v306_v3  ;;  %v497_v22 = vadd.f32 %v674_v20, %v336_v11 }
 0x20e   : > { %v461_v23 = vpop.f32.mrf.mxu0  ;;  %v491_v24 = vpop.f32.mrf.mxu1 }
 0x20f   : > { %513 = vst [vmem:[%s869_s28 + $0x18] sm:$0xff] %v467_v21  ;;  %519 = vst [vmem:[%s869_s28 + $0x48] sm:$0xff] %v497_v22  ;;  %v462_v26 = vadd.f32 %v461_v23, %v301_v2  ;;  %v492_v27 = vadd.f32 %v491_v24, %v331_v16 }
 0x210   : > { %v668_v28 = vpop.f32.mrf.mxu0  ;;  %v677_v29 = vpop.f32.mrf.mxu1 }
 0x211   : > { %512 = vst [vmem:[%s869_s28 + $0x10] sm:$0xff] %v462_v26  ;;  %518 = vst [vmem:[%s869_s28 + $0x40] sm:$0xff] %v492_v27  ;;  %v477_v31 = vadd.f32 %v668_v28, %v316_v5  ;;  %v507_v32 = vadd.f32 %v677_v29, %v346_v25 }
 0x212   : > { %v471_v33 = vpop.f32.mrf.mxu0  ;;  %v501_v34 = vpop.f32.mrf.mxu1 }
 0x213   : > { %515 = vst [vmem:[%s869_s28 + $0x28] sm:$0xff] %v477_v31  ;;  %521 = vst [vmem:[%s869_s28 + $0x58] sm:$0xff] %v507_v32  ;;  %v472_v35 = vadd.f32 %v471_v33, %v311_v4  ;;  %v502_v36 = vadd.f32 %v501_v34, %v341_v30 }
 0x215   : > { %514 = vst [vmem:[%s869_s28 + $0x20] sm:$0xff] %v472_v35  ;;  %520 = vst [vmem:[%s869_s28 + $0x50] sm:$0xff] %v502_v36 }
 0x216 PF: > { %s15_s15 = sadd.s32 1, %s712_s15  }
 0x217   : > { %p12_p4 = scmp.ge.s32.totalorder %s15_s15, 4  }
 0x219   :  { %14 = sbr.rel (!%p12_p4) target bundleno = 1 (0x1), region = 74 }

// kernel: oafilter_gnn_forward.12
= control target key start
LH: loop header
LB: loop body
LE: loop exit
PB: predicated region body
PF: predicated region fallthrough
CT: control target
= control target key end

     0   :  { %s1131_s12 = smov 0   ;;  %s1353_s0 = inlined_call_operand.vmem [shape: f32[8,128,8], index: 0, kind: input, shape index: {}]   ;;  %s1354_s1 = inlined_call_operand.vmem [shape: f32[8,8,128], index: 1, kind: input, shape index: {}]   ;;  %s1355_s2 = inlined_call_operand.vmem [shape: f32[8,128,8], index: 2, kind: input, shape index: {}]   ;;  %s1356_s3 = inlined_call_operand.vmem [shape: f32[8,128,8], index: 3, kind: output, shape index: {}]  }
   0x1 LB: > { %s835_s13 = sadd.s32 4294967295, %s1109_s12   ;;  %p839_p0 = scmp.ge.s32.totalorder %s1109_s12, 1  ;;  %s1109_s12 = sphi %s1131_s12, %s13_s12  }
   0x2   : > { %p156_p1 = scmp.lt.s32.totalorder %s1109_s12, 9 }
   0x4   : > { %p157_p2 = pnand %p839_p0, %p156_p1 }
   0x5   : > { %p189_p3 = scmp.lt.s32.totalorder (!%p157_p2), %s835_s13, 7 }
   0x6   : > { %160 = sbr.rel (%p157_p2) target bundleno = 766 (0x2fe), region = 32 }
   0xb   : > { %s1358_s13 = smov (!%p189_p3, %s835_s13), 7  ;;  %vm241_vm0 = vcmask 64512  }
   0xc   : > { %s1139_s14 = sshll.u32 %s1358_s13, 7  ;;  %s842_s15 = sshll.u32 %s1358_s13, 3 }
   0xd   : > { %s1145_s18 = scalar_lea.vmem %s1353_s0, %s1139_s14  ;;  %s197_s21 = scalar_lea.vmem %s1354_s1, %s842_s15 }
   0xe   : > { %v224_v0 = vld [vmem:[%s197_s21] sm:$0xff]  ;;  %v209_v2 = vld [vmem:[%s1145_s18 + $0x8] sm:$0xff]  ;;  %v210_v3 = vld [vmem:[%s1145_s18 + $0x10] sm:$0xff]  ;;  %s1219_s24 = scalar_lea.vmem %s1355_s2, %s1139_s14  ;;  %s1316_s27 = scalar_lea.vmem %s1356_s3, %s1139_s14 }
   0xf   : > { %v208_v1 = vld [vmem:[%s1145_s18] sm:$0xff]  ;;  %917 = vmatprep.subr.mxu0 %v224_v0  ;;  %v211_v4 = vld [vmem:[%s1145_s18 + $0x18] sm:$0xff]  ;;  %v213_v6 = vld [vmem:[%s1145_s18 + $0x28] sm:$0xff] }
  0x10   : > { %919 = vmatprep.mubr.msk.f32.mxu0 %vm241_vm0, %v208_v1  ;;  %918 = vmatpush3.msra.mxu0 %v224_v0  ;;  %v212_v5 = vld [vmem:[%s1145_s18 + $0x20] sm:$0xff]  ;;  %v214_v7 = vld [vmem:[%s1145_s18 + $0x30] sm:$0xff]  ;;  %v215_v8 = vld [vmem:[%s1145_s18 + $0x38] sm:$0xff] }
  0x11   : > { %920 = vmatmul.mubr.msk.f32.vlgmr.msra.gmra.mxu0 %vm241_vm0, %v209_v2  ;;  %v216_v9 = vld [vmem:[%s1145_s18 + $0x40] sm:$0xff]  ;;  %v217_v10 = vld [vmem:[%s1145_s18 + $0x48] sm:$0xff]  ;;  %v218_v11 = vld [vmem:[%s1145_s18 + $0x50] sm:$0xff] }
  0x12   : > { %922 = vmatprep.mubr.msk.f32.mxu0 %vm241_vm0, %v210_v3  ;;  %v219_v12 = vld [vmem:[%s1145_s18 + $0x58] sm:$0xff]  ;;  %v220_v13 = vld [vmem:[%s1145_s18 + $0x60] sm:$0xff]  ;;  %v221_v14 = vld [vmem:[%s1145_s18 + $0x68] sm:$0xff] }
  0x13   : > { %v222_v15 = vld [vmem:[%s1145_s18 + $0x70] sm:$0xff]  ;;  %v223_v16 = vld [vmem:[%s1145_s18 + $0x78] sm:$0xff] }
  0x14   : > { %v240_v49 = vld [vmem:[%s1219_s24 + $0x78] sm:$0xff]  ;;  %v239_v50 = vld [vmem:[%s1219_s24 + $0x70] sm:$0xff] }
  0x15   : > { %923 = vmatmul.mubr.msk.f32.gmra.mxu0 %vm241_vm0, %v211_v4  ;;  %943 = vmatprep.subr.mxu0 %v240_v49 }
  0x16   : > { %925 = vmatprep.mubr.msk.f32.mxu0 %vm241_vm0, %v212_v5  ;;  %999 = vmatprep.subr.mxu1 %v240_v49 }
  0x17   : > { %944 = vmatpush3.msra.mxu0 %v240_v49  ;;  %1015 = vmatpush3.msra.mxu1 %v240_v49  ;;  %v233_v49 = vld [vmem:[%s1219_s24 + $0x40] sm:$0xff] }
  0x18   : > { %945 = vmatprep.subr.mxu0 %v239_v50  ;;  %1000 = vmatprep.subr.mxu1 %v239_v50 }
  0x19   : > { %926 = vmatmul.mubr.msk.f32.gmra.mxu0 %vm241_vm0, %v213_v6  ;;  %1016 = vmatpush3.msra.mxu1 %v239_v50 }
  0x1a   : > { %928 = vmatprep.mubr.msk.f32.mxu0 %vm241_vm0, %v214_v7  ;;  %946 = vmatpush3.msra.mxu0 %v239_v50 }
  0x1d   : > { %929 = vmatmul.mubr.msk.f32.gmra.mxu0 %vm241_vm0, %v215_v8 }
  0x1e   : > { %931 = vmatprep.mubr.msk.f32.mxu0 %vm241_vm0, %v216_v9 }
  0x21   : > { %932 = vmatmul.mubr.msk.f32.gmra.mxu0 %vm241_vm0, %v217_v10 }
  0x22   : > { %934 = vmatprep.mubr.msk.f32.mxu0 %vm241_vm0, %v218_v11 }
  0x25   : > { %935 = vmatmul.mubr.msk.f32.gmra.mxu0 %vm241_vm0, %v219_v12 }
  0x26   : > { %937 = vmatprep.mubr.msk.f32.mxu0 %vm241_vm0, %v220_v13 }
  0x29   : > { %938 = vmatmul.mubr.msk.f32.gmra.mxu0 %vm241_vm0, %v221_v14 }
  0x2a   : > { %940 = vmatprep.mubr.msk.f32.mxu0 %vm241_vm0, %v222_v15 }
  0x2d   : > { %941 = vmatmul.mubr.msk.f32.gmra.mxu0 %vm241_vm0, %v223_v16 }
  0xd1   : > { %v921_v17 = vpop.f32.mrf.mxu0 }
  0xd2   : > { %v436_v33 = vmul.f32 0.35355338, %v921_v17 }
  0xd3   : > { %v356_v18 = vpop.f32.mrf.mxu0 }
  0xd4   : > { %v1182_v19 = vmul.f32 0.35355338, %v356_v18 }
  0xd5   : > { %v924_v20 = vpop.f32.mrf.mxu0 }
  0xd6   : > { %451 = vmax.xlane.f32.xlu0 %v1182_v19  ;;  %v1194_v40 = vmul.f32 0.35355338, %v924_v20 }
  0xd7   : > { %v366_v21 = vpop.f32.mrf.mxu0 }
  0xd8   : > { %v1191_v36 = vmul.f32 0.35355338, %v366_v21 }
  0xd9   : > { %v927_v22 = vpop.f32.mrf.mxu0 }
  0xda   : > { %v1205_v46 = vmul.f32 0.35355338, %v927_v22 }
  0xdb   : > { %v376_v23 = vpop.f32.mrf.mxu0 }
  0xdc   : > { %v1199_v43 = vmul.f32 0.35355338, %v376_v23 }
  0xdd   : > { %v930_v24 = vpop.f32.mrf.mxu0 }
  0xde   : > { %v442_v25 = vmul.f32 0.35355338, %v930_v24 }
  0xdf   : > { %v386_v26 = vpop.f32.mrf.mxu0 }
  0xe0   : > { %465 = vmax.xlane.f32.xlu0 %v442_v25  ;;  %v1185_v28 = vmul.f32 0.35355338, %v386_v26 }
  0xe1   : > { %v933_v27 = vpop.f32.mrf.mxu0 }
  0xe2   : > { %v444_v29 = vmul.f32 0.35355338, %v933_v27 }
  0xe3   : > { %v396_v30 = vpop.f32.mrf.mxu0 }
  0xe4   : > { %463 = vmax.xlane.f32.xlu0 %v1185_v28  ;;  %469 = vmax.xlane.f32.xlu1 %v444_v29  ;;  %v1188_v31 = vmul.f32 0.35355338, %v396_v30  ;;  %v238_v30 = vld [vmem:[%s1219_s24 + $0x68] sm:$0xff] }
  0xe5   : > { %v936_v32 = vpop.f32.mrf.mxu0  ;;  %947 = vmatprep.subr.mxu0 %v238_v30  ;;  %1001 = vmatprep.subr.mxu1 %v238_v30 }
  0xe6   : > { %v446_v34 = vmul.f32 0.35355338, %v936_v32  ;;  %948 = vmatpush3.msra.mxu0 %v238_v30  ;;  %1017 = vmatpush3.msra.mxu1 %v238_v30 }
  0xe7   : > { %v406_v35 = vpop.f32.mrf.mxu0 }
  0xe8   : > { %453 = vmax.xlane.f32.xlu0 %v436_v33  ;;  %467 = vmax.xlane.f32.xlu1 %v1188_v31  ;;  %v445_v38 = vmul.f32 0.35355338, %v406_v35 }
  0xe9   : > { %v939_v37 = vpop.f32.mrf.mxu0 }
  0xea   : > { %v1197_v41 = vmul.f32 0.35355338, %v939_v37 }
  0xeb   : > { %v416_v39 = vpop.f32.mrf.mxu0 }
  0xec   : > { %455 = vmax.xlane.f32.xlu0 %v1191_v36  ;;  %473 = vmax.xlane.f32.xlu1 %v446_v34  ;;  %v1203_v44 = vmul.f32 0.35355338, %v416_v39 }
  0xed   : > { %v942_v42 = vpop.f32.mrf.mxu0 }
  0xee   : > { %v1212_v48 = vmul.f32 0.35355338, %v942_v42  ;;  %v235_v42 = vld [vmem:[%s1219_s24 + $0x50] sm:$0xff] }
  0xef   : > { %v426_v45 = vpop.f32.mrf.mxu0 }
  0xf0   : > { %457 = vmax.xlane.f32.xlu0 %v1194_v40  ;;  %471 = vmax.xlane.f32.xlu1 %v445_v38  ;;  %v1209_v47 = vmul.f32 0.35355338, %v426_v45 }
  0xf4   : > { %459 = vmax.xlane.f32.xlu0 %v1199_v43  ;;  %477 = vmax.xlane.f32.xlu1 %v1197_v41 }
  0xf8   : > { %461 = vmax.xlane.f32.xlu0 %v1205_v46  ;;  %475 = vmax.xlane.f32.xlu1 %v1203_v44 }
  0xfc   : > { %479 = vmax.xlane.f32.xlu1 %v1209_v47 }
 0x100   : > { %481 = vmax.xlane.f32.xlu1 %v1212_v48 }
 0x15f   : > { %v452_v51 = vpop.xlane.xlu0 %451 }
 0x160   : > { %v483_v61 = vsub.f32 %v1182_v19, %v452_v51  ;;  %v232_v51 = vld [vmem:[%s1219_s24 + $0x38] sm:$0xff] }
 0x162   : > { %v499_v2 = vmul.f32 1.442695, %v483_v61 }
 0x169   : > { %v466_v52 = vpop.xlane.xlu0 %465 }
 0x16a   : > { %v490_v53 = vsub.f32 %v442_v25, %v466_v52 }
 0x16c   : > { %v513_v54 = vmul.f32 1.442695, %v490_v53  ;;  %v231_v53 = vld [vmem:[%s1219_s24 + $0x30] sm:$0xff] }
 0x16d   : > { %v464_v55 = vpop.xlane.xlu0 %463  ;;  %v470_v56 = vpop.xlane.xlu1 %469 }
 0x16e   : > { %1039 = vpow2.f32 %v513_v54  ;;  %v492_v57 = vsub.f32 %v444_v29, %v470_v56  ;;  %v489_v3 = vsub.f32 %v1185_v28, %v464_v55  ;;  %v230_v56 = vld [vmem:[%s1219_s24 + $0x28] sm:$0xff] }
 0x170   : > { %v517_v58 = vmul.f32 1.442695, %v492_v57  ;;  %v511_v7 = vmul.f32 1.442695, %v489_v3 }
 0x171   : > { %v454_v59 = vpop.xlane.xlu0 %453  ;;  %v468_v60 = vpop.xlane.xlu1 %467 }
 0x172   : > { %v484_v62 = vsub.f32 %v436_v33, %v454_v59  ;;  %1041 = vpow2.f32 %v517_v58  ;;  %v491_v8 = vsub.f32 %v1188_v31, %v468_v60  ;;  %v237_v31 = vld [vmem:[%s1219_s24 + $0x60] sm:$0xff]  ;;  %v228_v60 = vld [vmem:[%s1219_s24 + $0x18] sm:$0xff] }
 0x173   : > { %949 = vmatprep.subr.mxu0 %v237_v31  ;;  %1002 = vmatprep.subr.mxu1 %v237_v31  ;;  %v229_v59 = vld [vmem:[%s1219_s24 + $0x20] sm:$0xff] }
 0x174   : > { %v501_v63 = vmul.f32 1.442695, %v484_v62  ;;  %v515_v14 = vmul.f32 1.442695, %v491_v8  ;;  %950 = vmatpush3.msra.mxu0 %v237_v31  ;;  %1018 = vmatpush3.msra.mxu1 %v237_v31  ;;  %v227_v62 = vld [vmem:[%s1219_s24 + $0x10] sm:$0xff] }
 0x175   : > { %v456_v0 = vpop.xlane.xlu0 %455  ;;  %v474_v1 = vpop.xlane.xlu1 %473 }
 0x176   : > { %1043 = vpow2.f32 %v501_v63  ;;  %v494_v4 = vsub.f32 %v446_v34, %v474_v1  ;;  %v485_v15 = vsub.f32 %v1191_v36, %v456_v0  ;;  %v226_v63 = vld [vmem:[%s1219_s24 + $0x8] sm:$0xff]  ;;  %v225_v0 = vld [vmem:[%s1219_s24] sm:$0xff] }
 0x177   : > { %1045 = vpow2.f32 %v499_v2 }
 0x178   : > { %v521_v5 = vmul.f32 1.442695, %v494_v4  ;;  %v503_v22 = vmul.f32 1.442695, %v485_v15 }
 0x179   : > { %v472_v6 = vpop.xlane.xlu1 %471  ;;  %v458_v11 = vpop.xlane.xlu0 %457 }
 0x17a   : > { %v493_v9 = vsub.f32 %v445_v38, %v472_v6  ;;  %1047 = vpow2.f32 %v521_v5  ;;  %v486_v19 = vsub.f32 %v1194_v40, %v458_v11 }
 0x17b   : > { %v1226_v10 = vpop.eup %1039  ;;  %1049 = vpow2.f32 %v511_v7 }
 0x17c   : > { %v519_v12 = vmul.f32 1.442695, %v493_v9  ;;  %545 = vadd.xlane.f32.xlu1 %v1226_v10  ;;  %v505_v26 = vmul.f32 1.442695, %v486_v19 }
 0x17d   : > { %v478_v13 = vpop.xlane.xlu1 %477  ;;  %v460_v20 = vpop.xlane.xlu0 %459 }
 0x17e   : > { %v496_v16 = vsub.f32 %v1197_v41, %v478_v13  ;;  %1051 = vpow2.f32 %v519_v12  ;;  %v487_v27 = vsub.f32 %v1199_v43, %v460_v20  ;;  %v236_v41 = vld [vmem:[%s1219_s24 + $0x58] sm:$0xff] }
 0x17f   : > { %v1231_v17 = vpop.eup %1041  ;;  %1053 = vpow2.f32 %v515_v14  ;;  %951 = vmatprep.subr.mxu0 %v236_v41  ;;  %1003 = vmatprep.subr.mxu1 %v236_v41 }
 0x180   : > { %v525_v18 = vmul.f32 1.442695, %v496_v16  ;;  %549 = vadd.xlane.f32.xlu1 %v1231_v17  ;;  %v507_v36 = vmul.f32 1.442695, %v487_v27  ;;  %952 = vmatpush3.msra.mxu0 %v236_v41 }
 0x181   : > { %v476_v21 = vpop.xlane.xlu1 %475  ;;  %v462_v33 = vpop.xlane.xlu0 %461  ;;  %953 = vmatprep.subr.mxu0 %v235_v42  ;;  %1019 = vmatpush3.msra.mxu1 %v236_v41 }
 0x182   : > { %v495_v23 = vsub.f32 %v1203_v44, %v476_v21  ;;  %1055 = vpow2.f32 %v525_v18  ;;  %v488_v38 = vsub.f32 %v1205_v46, %v462_v33  ;;  %v234_v46 = vld [vmem:[%s1219_s24 + $0x48] sm:$0xff]  ;;  %954 = vmatpush3.msra.mxu0 %v235_v42  ;;  %1004 = vmatprep.subr.mxu1 %v235_v42 }
 0x183   : > { %v1236_v24 = vpop.eup %1043  ;;  %1057 = vpow2.f32 %v503_v22  ;;  %955 = vmatprep.subr.mxu0 %v234_v46  ;;  %1020 = vmatpush3.msra.mxu1 %v235_v42 }
 0x184   : > { %v523_v25 = vmul.f32 1.442695, %v495_v23  ;;  %533 = vadd.xlane.f32.xlu0 %v1236_v24  ;;  %v1243_v32 = vpop.eup %1045  ;;  %v509_v45 = vmul.f32 1.442695, %v488_v38  ;;  %956 = vmatpush3.msra.mxu0 %v234_v46 }
 0x185   : > { %v480_v28 = vpop.xlane.xlu1 %479  ;;  %957 = vmatprep.subr.mxu0 %v233_v49  ;;  %1005 = vmatprep.subr.mxu1 %v234_v46 }
 0x186   : > { %v497_v29 = vsub.f32 %v1209_v47, %v480_v28  ;;  %1059 = vpow2.f32 %v523_v25  ;;  %958 = vmatpush3.msra.mxu0 %v233_v49  ;;  %1021 = vmatpush3.msra.mxu1 %v234_v46 }
 0x187   : > { %v1245_v34 = vpop.eup %1047  ;;  %1061 = vpow2.f32 %v505_v26  ;;  %959 = vmatprep.subr.mxu0 %v232_v51  ;;  %1006 = vmatprep.subr.mxu1 %v233_v49 }
 0x188   : > { %v527_v35 = vmul.f32 1.442695, %v497_v29  ;;  %531 = vadd.xlane.f32.xlu0 %v1243_v32  ;;  %553 = vadd.xlane.f32.xlu1 %v1245_v34  ;;  %v1251_v40 = vpop.eup %1049 }
 0x189   : > { %v482_v37 = vpop.xlane.xlu1 %481  ;;  %960 = vmatpush3.msra.mxu0 %v232_v51  ;;  %1022 = vmatpush3.msra.mxu1 %v233_v49 }
 0x18a   : > { %1063 = vpow2.f32 %v527_v35  ;;  %v498_v39 = vsub.f32 %v1212_v48, %v482_v37  ;;  %961 = vmatprep.subr.mxu0 %v231_v53  ;;  %1007 = vmatprep.subr.mxu1 %v232_v51 }
 0x18b   : > { %v1255_v43 = vpop.eup %1051  ;;  %1065 = vpow2.f32 %v507_v36  ;;  %962 = vmatpush3.msra.mxu0 %v231_v53  ;;  %1023 = vmatpush3.msra.mxu1 %v232_v51 }
 0x18c   : > { %v529_v44 = vmul.f32 1.442695, %v498_v39  ;;  %543 = vadd.xlane.f32.xlu0 %v1251_v40  ;;  %551 = vadd.xlane.f32.xlu1 %v1255_v43  ;;  %v1260_v47 = vpop.eup %1053 }
 0x18d   : > { %963 = vmatprep.subr.mxu0 %v230_v56  ;;  %1008 = vmatprep.subr.mxu1 %v231_v53 }
 0x18e   : > { %1067 = vpow2.f32 %v529_v44  ;;  %964 = vmatpush3.msra.mxu0 %v230_v56  ;;  %1024 = vmatpush3.msra.mxu1 %v231_v53 }
 0x18f   : > { %v1262_v48 = vpop.eup %1055  ;;  %1069 = vpow2.f32 %v509_v45  ;;  %965 = vmatprep.subr.mxu0 %v229_v59  ;;  %1009 = vmatprep.subr.mxu1 %v230_v56 }
 0x190   : > { %547 = vadd.xlane.f32.xlu0 %v1260_v47  ;;  %557 = vadd.xlane.f32.xlu1 %v1262_v48  ;;  %v1267_v50 = vpop.eup %1057 }
 0x191   : > { %966 = vmatpush3.msra.mxu0 %v229_v59  ;;  %1025 = vmatpush3.msra.mxu1 %v230_v56 }
 0x192   : > { %967 = vmatprep.subr.mxu0 %v228_v60  ;;  %1010 = vmatprep.subr.mxu1 %v229_v59 }
 0x193   : > { %v1270_v52 = vpop.eup %1059  ;;  %968 = vmatpush3.msra.mxu0 %v228_v60  ;;  %1026 = vmatpush3.msra.mxu1 %v229_v59 }
 0x194   : > { %535 = vadd.xlane.f32.xlu0 %v1267_v50  ;;  %555 = vadd.xlane.f32.xlu1 %v1270_v52  ;;  %v1275_v54 = vpop.eup %1061 }
 0x195   : > { %969 = vmatprep.subr.mxu0 %v227_v62  ;;  %1011 = vmatprep.subr.mxu1 %v228_v60 }
 0x196   : > { %970 = vmatpush3.msra.mxu0 %v227_v62  ;;  %1027 = vmatpush3.msra.mxu1 %v228_v60 }
 0x197   : > { %v1277_v55 = vpop.eup %1063  ;;  %971 = vmatprep.subr.mxu0 %v226_v63  ;;  %1012 = vmatprep.subr.mxu1 %v227_v62 }
 0x198   : > { %537 = vadd.xlane.f32.xlu0 %v1275_v54  ;;  %559 = vadd.xlane.f32.xlu1 %v1277_v55  ;;  %v1282_v57 = vpop.eup %1065 }
 0x199   : > { %972 = vmatpush3.msra.mxu0 %v226_v63  ;;  %1028 = vmatpush3.msra.mxu1 %v227_v62 }
 0x19a   : > { %973 = vmatprep.subr.mxu0 %v225_v0  ;;  %1013 = vmatprep.subr.mxu1 %v226_v63 }
 0x19b   : > { %v1284_v58 = vpop.eup %1067  ;;  %974 = vmatpush3.msra.mxu0 %v225_v0  ;;  %1029 = vmatpush3.msra.mxu1 %v226_v63 }
 0x19c   : > { %539 = vadd.xlane.f32.xlu0 %v1282_v57  ;;  %561 = vadd.xlane.f32.xlu1 %v1284_v58  ;;  %v1290_v61 = vpop.eup %1069 }
 0x19d   : > { %1014 = vmatprep.subr.mxu1 %v225_v0 }
 0x19e   : > { %1030 = vmatpush3.msra.mxu1 %v225_v0 }
 0x1a0   : > { %541 = vadd.xlane.f32.xlu0 %v1290_v61 }
 0x205   : > { %v546_v1 = vpop.xlane.xlu1 %545 }
 0x209   : > { %v550_v3 = vpop.xlane.xlu1 %549 }
 0x20d   : > { %v534_v2 = vpop.xlane.xlu0 %533 }
 0x20e   : > { %1071 = vrcp.f32 %v534_v2 }
 0x211   : > { %v532_v4 = vpop.xlane.xlu0 %531  ;;  %v554_v5 = vpop.xlane.xlu1 %553 }
 0x212   : > { %1073 = vrcp.f32 %v532_v4 }
 0x213   : > { %1075 = vrcp.f32 %v546_v1 }
 0x215   : > { %v544_v6 = vpop.xlane.xlu0 %543  ;;  %v552_v7 = vpop.xlane.xlu1 %551 }
 0x216   : > { %1077 = vrcp.f32 %v544_v6 }
 0x217   : > { %1079 = vrcp.f32 %v550_v3 }
 0x218   : > { %1081 = vrcp.f32 %v552_v7 }
 0x219   : > { %v548_v8 = vpop.xlane.xlu0 %547  ;;  %v558_v9 = vpop.xlane.xlu1 %557 }
 0x21a   : > { %1083 = vrcp.f32 %v548_v8 }
 0x21b   : > { %1085 = vrcp.f32 %v554_v5  ;;  %v1072_v12 = vpop.eup %1071 }
 0x21c   : > { %v580_v18 = vmul.f32 %v1072_v12, %v1236_v24 }
 0x21d   : > { %v536_v11 = vpop.xlane.xlu0 %535  ;;  %v556_v13 = vpop.xlane.xlu1 %555 }
 0x21e   : > { %1087 = vrcp.f32 %v536_v11 }
 0x21f   : > { %v1074_v14 = vpop.eup %1073  ;;  %1089 = vrcp.f32 %v556_v13 }
 0x220   : > { %v579_v15 = vmul.f32 %v1074_v14, %v1243_v32  ;;  %1091 = vrcp.f32 %v558_v9  ;;  %v1076_v19 = vpop.eup %1075 }
 0x221   : > { %v538_v16 = vpop.xlane.xlu0 %537  ;;  %v560_v20 = vpop.xlane.xlu1 %559  ;;  %v586_v26 = vmul.f32 %v1076_v19, %v1226_v10 }
 0x222   : > { %1093 = vrcp.f32 %v538_v16  ;;  %975 = vmatprep.mubr.f32.mxu0 %v579_v15 }
 0x223   : > { %v1078_v21 = vpop.eup %1077  ;;  %1095 = vrcp.f32 %v560_v20  ;;  %976 = vmatmul.mubr.f32.vlgmr.msra.gmra.mxu0 %v580_v18 }
 0x224   : > { %v585_v22 = vmul.f32 %v1078_v21, %v1251_v40  ;;  %v1080_v23 = vpop.eup %1079 }
 0x225   : > { %v540_v25 = vpop.xlane.xlu0 %539  ;;  %v1082_v27 = vpop.eup %1081  ;;  %v588_v31 = vmul.f32 %v1080_v23, %v1231_v17 }
 0x226   : > { %1097 = vrcp.f32 %v540_v25  ;;  %v562_v28 = vpop.xlane.xlu1 %561  ;;  %984 = vmatprep.mubr.f32.mxu1 %v585_v22  ;;  %v589_v33 = vmul.f32 %v1082_v27, %v1255_v43 }
 0x227   : > { %v1084_v29 = vpop.eup %1083  ;;  %1099 = vrcp.f32 %v562_v28  ;;  %985 = vmatmul.mubr.f32.vlgmr.msra.gmra.mxu1 %v586_v26 }
 0x228   : > { %v587_v24 = vmul.f32 %v1084_v29, %v1260_v47  ;;  %v1086_v32 = vpop.eup %1085 }
 0x229   : > { %v542_v30 = vpop.xlane.xlu0 %541  ;;  %v590_v37 = vmul.f32 %v1086_v32, %v1245_v34 }
 0x22a   : > { %1101 = vrcp.f32 %v542_v30  ;;  %987 = vmatprep.mubr.f32.mxu1 %v587_v24 }
 0x22b   : > { %v1088_v35 = vpop.eup %1087  ;;  %988 = vmatmul.mubr.f32.gmra.mxu1 %v588_v31 }
 0x22c   : > { %v1090_v10 = vpop.eup %1089  ;;  %990 = vmatprep.mubr.f32.mxu1 %v589_v33  ;;  %v581_v36 = vmul.f32 %v1088_v35, %v1267_v50 }
 0x22d   : > { %v1092_v38 = vpop.eup %1091  ;;  %v591_v39 = vmul.f32 %v1090_v10, %v1270_v52 }
 0x22e   : > { %978 = vmatprep.mubr.f32.mxu0 %v581_v36  ;;  %v592_v42 = vmul.f32 %v1092_v38, %v1262_v48 }
 0x22f   : > { %v1094_v40 = vpop.eup %1093  ;;  %991 = vmatmul.mubr.f32.gmra.mxu1 %v590_v37 }
 0x230   : > { %v1096_v17 = vpop.eup %1095  ;;  %993 = vmatprep.mubr.f32.mxu1 %v591_v39  ;;  %v582_v41 = vmul.f32 %v1094_v40, %v1275_v54 }
 0x231   : > { %v593_v43 = vmul.f32 %v1096_v17, %v1277_v55 }
 0x232   : > { %979 = vmatmul.mubr.f32.gmra.mxu0 %v582_v41 }
 0x233   : > { %v1098_v44 = vpop.eup %1097  ;;  %994 = vmatmul.mubr.f32.gmra.mxu1 %v592_v42 }
 0x234   : > { %v1100_v45 = vpop.eup %1099  ;;  %996 = vmatprep.mubr.f32.mxu1 %v593_v43  ;;  %v583_v34 = vmul.f32 %v1098_v44, %v1282_v57 }
 0x235   : > { %v594_v46 = vmul.f32 %v1100_v45, %v1284_v58 }
 0x236   : > { %981 = vmatprep.mubr.f32.mxu0 %v583_v34 }
 0x237   : > { %v1102_v47 = vpop.eup %1101  ;;  %997 = vmatmul.mubr.f32.gmra.mxu1 %v594_v46 }
 0x238   : > { %v584_v49 = vmul.f32 %v1102_v47, %v1290_v61 }
 0x23a   : > { %982 = vmatmul.mubr.f32.gmra.mxu0 %v584_v49 }
 0x2e3   : > { %v977_v48 = vpop.f32.mrf.mxu0 }
 0x2e4   : > { %741 = vst.msk [vmem:[%s1316_s27 + $0x8] sm:$0xff] %vm241_vm0, %v977_v48 }
 0x2e5   : > { %v661_v50 = vpop.f32.mrf.mxu0 }
 0x2e6   : > { %740 = vst.msk [vmem:[%s1316_s27] sm:$0xff] %vm241_vm0, %v661_v50 }
 0x2e7   : > { %v986_v51 = vpop.f32.mrf.mxu1 }
 0x2e8   : > { %747 = vst.msk [vmem:[%s1316_s27 + $0x38] sm:$0xff] %vm241_vm0, %v986_v51 }
 0x2e9   : > { %v691_v52 = vpop.f32.mrf.mxu1 }
 0x2ea   : > { %746 = vst.msk [vmem:[%s1316_s27 + $0x30] sm:$0xff] %vm241_vm0, %v691_v52 }
 0x2eb   : > { %v989_v53 = vpop.f32.mrf.mxu1 }
 0x2ec   : > { %749 = vst.msk [vmem:[%s1316_s27 + $0x48] sm:$0xff] %vm241_vm0, %v989_v53 }
 0x2ed   : > { %v701_v54 = vpop.f32.mrf.mxu1 }
 0x2ee   : > { %748 = vst.msk [vmem:[%s1316_s27 + $0x40] sm:$0xff] %vm241_vm0, %v701_v54 }
 0x2ef   : > { %v992_v55 = vpop.f32.mrf.mxu1 }
 0x2f0   : > { %751 = vst.msk [vmem:[%s1316_s27 + $0x58] sm:$0xff] %vm241_vm0, %v992_v55 }
 0x2f1   : > { %v711_v56 = vpop.f32.mrf.mxu1 }
 0x2f2   : > { %750 = vst.msk [vmem:[%s1316_s27 + $0x50] sm:$0xff] %vm241_vm0, %v711_v56  ;;  %v980_v57 = vpop.f32.mrf.mxu0 }
 0x2f3   : > { %743 = vst.msk [vmem:[%s1316_s27 + $0x18] sm:$0xff] %vm241_vm0, %v980_v57  ;;  %v995_v58 = vpop.f32.mrf.mxu1 }
 0x2f4   : > { %753 = vst.msk [vmem:[%s1316_s27 + $0x68] sm:$0xff] %vm241_vm0, %v995_v58  ;;  %v671_v59 = vpop.f32.mrf.mxu0 }
 0x2f5   : > { %742 = vst.msk [vmem:[%s1316_s27 + $0x10] sm:$0xff] %vm241_vm0, %v671_v59  ;;  %v721_v60 = vpop.f32.mrf.mxu1 }
 0x2f6   : > { %752 = vst.msk [vmem:[%s1316_s27 + $0x60] sm:$0xff] %vm241_vm0, %v721_v60 }
 0x2f7   : > { %v998_v61 = vpop.f32.mrf.mxu1 }
 0x2f8   : > { %755 = vst.msk [vmem:[%s1316_s27 + $0x78] sm:$0xff] %vm241_vm0, %v998_v61 }
 0x2f9   : > { %v731_v62 = vpop.f32.mrf.mxu1 }
 0x2fa   : > { %754 = vst.msk [vmem:[%s1316_s27 + $0x70] sm:$0xff] %vm241_vm0, %v731_v62  ;;  %v983_v63 = vpop.f32.mrf.mxu0 }
 0x2fb   : > { %745 = vst.msk [vmem:[%s1316_s27 + $0x28] sm:$0xff] %vm241_vm0, %v983_v63 }
 0x2fc   : > { %v681_v0 = vpop.f32.mrf.mxu0 }
 0x2fd   : > { %744 = vst.msk [vmem:[%s1316_s27 + $0x20] sm:$0xff] %vm241_vm0, %v681_v0 }
 0x2fe PF: > { %s13_s12 = sadd.s32 1, %s1109_s12  }
 0x2ff   : > { %p10_p4 = scmp.ge.s32.totalorder %s13_s12, 10  }
 0x301   :  { %12 = sbr.rel (!%p10_p4) target bundleno = 1 (0x1), region = 68 }

// kernel: oafilter_gnn_forward.13
= control target key start
LH: loop header
LB: loop body
LE: loop exit
PB: predicated region body
PF: predicated region fallthrough
CT: control target
= control target key end

     0   :  { %s447_s12 = smov 0   ;;  %s499_s0 = inlined_call_operand.vmem [shape: f32[2,32,128], index: 0, kind: input, shape index: {}]   ;;  %s500_s1 = inlined_call_operand.vmem [shape: f32[32,32], index: 1, kind: input, shape index: {}]   ;;  %s501_s2 = inlined_call_operand.vmem [shape: f32[32,1], index: 2, kind: input, shape index: {}]   ;;  %s502_s3 = inlined_call_operand.vmem [shape: f32[2,32,128], index: 3, kind: output, shape index: {}]  }
   0x1 LB: > { %s360_s13 = sadd.s32 4294967295, %s424_s12   ;;  %p364_p0 = scmp.ge.s32.totalorder %s424_s12, 1  ;;  %s424_s12 = sphi %s447_s12, %s13_s12  }
   0x2   : > { %p137_p1 = scmp.lt.s32.totalorder %s424_s12, 3 }
   0x4   : > { %p138_p2 = pnand %p364_p0, %p137_p1 }
   0x5   : > { %p161_p3 = scmp.lt.s32.totalorder (!%p138_p2), %s360_s13, 1 }
   0x6   : > { %141 = sbr.rel (%p138_p2) target bundleno = 221 (0xdd), region = 32 }
   0xb   : > { %v171_v0 = vld [vmem:[%s500_s1] sm:$0xff]  ;;  %vm203_vm0 = vcmask 261120   ;;  %v173_v1 = vld [vmem:[%s500_s1 + $0x10] sm:$0xff]  ;;  %s504_s13 = smov (!%p161_p3, %s360_s13), 1  ;;  %v426_v4 = vmov 0   ;;  %v172_v9 = vld [vmem:[%s500_s1 + $0x8] sm:$0xff] }
   0xc   : > { %393 = vmatprep.mubr.msk.f32.mxu0 %vm203_vm0, %v171_v0  ;;  %396 = vmatprep.mubr.msk.f32.mxu1 %vm203_vm0, %v173_v1  ;;  %v181_v2 = vld [vmem:[%s501_s2 + $0x10] sm:$0xff]  ;;  %v179_v3 = vld [vmem:[%s501_s2] sm:$0xff]  ;;  %s375_s22 = sshll.u32 %s504_s13, 5  ;;  %v174_v10 = vld [vmem:[%s500_s1 + $0x18] sm:$0xff] }
   0xd   : > { %417 = vset.pattern.permute.xlu1 %v426_v4  ;;  %416 = vset.pattern.permute.xlu0 %v426_v4  ;;  %s165_s25 = scalar_lea.vmem %s499_s0, %s375_s22  ;;  %v182_v11 = vld [vmem:[%s501_s2 + $0x18] sm:$0xff]  ;;  %v180_v12 = vld [vmem:[%s501_s2 + $0x8] sm:$0xff]  ;;  %s170_s9 = scalar_lea.vmem %s502_s3, %s375_s22 }
   0xe   : > { %195 = vperm.xlu1 %417, %v181_v2   ;;  %185 = vperm.xlu0 %416, %v179_v3   ;;  %v178_v5 = vld [vmem:[%s165_s25 + $0x18] sm:$0xff]  ;;  %v177_v6 = vld [vmem:[%s165_s25 + $0x10] sm:$0xff]  ;;  %v176_v7 = vld [vmem:[%s165_s25 + $0x8] sm:$0xff] }
   0xf   : > { %385 = vmatprep.subr.mxu0 %v178_v5  ;;  %399 = vmatprep.subr.mxu1 %v178_v5  ;;  %v175_v8 = vld [vmem:[%s165_s25] sm:$0xff] }
  0x10   : > { %386 = vmatpush3.msra.mxu0 %v178_v5  ;;  %403 = vmatpush3.msra.mxu1 %v178_v5 }
  0x11   : > { %387 = vmatprep.subr.mxu0 %v177_v6  ;;  %400 = vmatprep.subr.mxu1 %v177_v6 }
  0x12   : > { %388 = vmatpush3.msra.mxu0 %v177_v6  ;;  %404 = vmatpush3.msra.mxu1 %v177_v6 }
  0x13   : > { %389 = vmatprep.subr.mxu0 %v176_v7  ;;  %401 = vmatprep.subr.mxu1 %v176_v7 }
  0x14   : > { %390 = vmatpush3.msra.mxu0 %v176_v7  ;;  %405 = vmatpush3.msra.mxu1 %v176_v7 }
  0x15   : > { %391 = vmatprep.subr.mxu0 %v175_v8  ;;  %402 = vmatprep.subr.mxu1 %v175_v8 }
  0x16   : > { %392 = vmatpush3.msra.mxu0 %v175_v8  ;;  %406 = vmatpush3.msra.mxu1 %v175_v8 }
  0x17   : > { %394 = vmatmul.mubr.msk.f32.vlgmr.msra.gmra.mxu0 %vm203_vm0, %v172_v9  ;;  %397 = vmatmul.mubr.msk.f32.vlgmr.msra.gmra.mxu1 %vm203_vm0, %v174_v10 }
  0x18   : > { %200 = vperm.xlu1 %417, %v182_v11   ;;  %190 = vperm.xlu0 %416, %v180_v12  }
  0x89   : > { %v196_v13 = vpop.permute.xlu1 %195  ;;  %v186_v14 = vpop.permute.xlu0 %185 }
  0x93   : > { %v201_v15 = vpop.permute.xlu1 %200  ;;  %v191_v16 = vpop.permute.xlu0 %190 }
  0xd7   : > { %v395_v17 = vpop.f32.mrf.mxu0  ;;  %v398_v18 = vpop.f32.mrf.mxu1 }
  0xd8   : > { %v288_v19 = vadd.f32 %v395_v17, %v191_v16  ;;  %v298_v20 = vadd.f32 %v398_v18, %v201_v15 }
  0xd9   : > { %v282_v21 = vpop.f32.mrf.mxu0  ;;  %v292_v22 = vpop.f32.mrf.mxu1 }
  0xda   : > { %302 = vst [vmem:[%s170_s9 + $0x8] sm:$0xff] %v288_v19  ;;  %304 = vst [vmem:[%s170_s9 + $0x18] sm:$0xff] %v298_v20  ;;  %v283_v23 = vadd.f32 %v282_v21, %v186_v14  ;;  %v293_v24 = vadd.f32 %v292_v22, %v196_v13 }
  0xdc   : > { %301 = vst [vmem:[%s170_s9] sm:$0xff] %v283_v23  ;;  %303 = vst [vmem:[%s170_s9 + $0x10] sm:$0xff] %v293_v24 }
  0xdd PF: > { %s13_s12 = sadd.s32 1, %s424_s12  }
  0xde   : > { %p10_p4 = scmp.ge.s32.totalorder %s13_s12, 4  }
  0xe0   :  { %12 = sbr.rel (!%p10_p4) target bundleno = 1 (0x1), region = 62 }

// kernel: oafilter_gnn_forward.14
= control target key start
LH: loop header
LB: loop body
LE: loop exit
PB: predicated region body
PF: predicated region fallthrough
CT: control target
= control target key end

     0   :  { %s549_s12 = smov 0   ;;  %s639_s0 = inlined_call_operand.vmem [shape: f32[2,64,128], index: 0, kind: input, shape index: {}]   ;;  %s640_s1 = inlined_call_operand.vmem [shape: f32[64,64], index: 1, kind: input, shape index: {}]   ;;  %s641_s2 = inlined_call_operand.vmem [shape: f32[64,1], index: 2, kind: input, shape index: {}]   ;;  %s642_s3 = inlined_call_operand.vmem [shape: f32[2,64,128], index: 3, kind: output, shape index: {}]  }
   0x1 LB: > { %s428_s13 = sadd.s32 4294967295, %s526_s12   ;;  %p432_p0 = scmp.ge.s32.totalorder %s526_s12, 1  ;;  %s526_s12 = sphi %s549_s12, %s13_s12  }
   0x2   : > { %p137_p1 = scmp.lt.s32.totalorder %s526_s12, 3 }
   0x4   : > { %p138_p2 = pnand %p432_p0, %p137_p1 }
   0x5   : > { %p161_p3 = scmp.lt.s32.totalorder (!%p138_p2), %s428_s13, 1 }
   0x6   : > { %141 = sbr.rel (%p138_p2) target bundleno = 233 (0xe9), region = 32 }
   0xb   : > { %v171_v0 = vld [vmem:[%s640_s1] sm:$0xff]  ;;  %vm235_vm0 = vcmask 523264   ;;  %s644_s13 = smov (!%p161_p3, %s428_s13), 1  ;;  %v528_v2 = vmov 0   ;;  %v189_v3 = vld [vmem:[%s641_s2 + $0x10] sm:$0xff]  ;;  %v172_v13 = vld [vmem:[%s640_s1 + $0x8] sm:$0xff] }
   0xc   : > { %v175_v1 = vld [vmem:[%s640_s1 + $0x20] sm:$0xff]  ;;  %481 = vmatprep.mubr.msk.f32.mxu0 %vm235_vm0, %v171_v0  ;;  %519 = vset.pattern.permute.xlu1 %v528_v2  ;;  %s447_s22 = sshll.u32 %s644_s13, 6  ;;  %v176_v14 = vld [vmem:[%s640_s1 + $0x28] sm:$0xff]  ;;  %v173_v15 = vld [vmem:[%s640_s1 + $0x10] sm:$0xff] }
   0xd   : > { %487 = vmatprep.mubr.msk.f32.mxu1 %vm235_vm0, %v175_v1  ;;  %518 = vset.pattern.permute.xlu0 %v528_v2  ;;  %v187_v4 = vld [vmem:[%s641_s2] sm:$0xff]  ;;  %s579_s25 = scalar_lea.vmem %s639_s0, %s447_s22  ;;  %v177_v16 = vld [vmem:[%s640_s1 + $0x30] sm:$0xff]  ;;  %v190_v17 = vld [vmem:[%s641_s2 + $0x18] sm:$0xff]  ;;  %s170_s28 = scalar_lea.vmem %s642_s3, %s447_s22 }
   0xe   : > { %207 = vperm.xlu1 %519, %v189_v3   ;;  %197 = vperm.xlu0 %518, %v187_v4   ;;  %v186_v5 = vld [vmem:[%s579_s25 + $0x38] sm:$0xff]  ;;  %v185_v6 = vld [vmem:[%s579_s25 + $0x30] sm:$0xff]  ;;  %v184_v7 = vld [vmem:[%s579_s25 + $0x28] sm:$0xff] }
   0xf   : > { %465 = vmatprep.subr.mxu0 %v186_v5  ;;  %493 = vmatprep.subr.mxu1 %v186_v5  ;;  %v183_v8 = vld [vmem:[%s579_s25 + $0x20] sm:$0xff]  ;;  %v182_v9 = vld [vmem:[%s579_s25 + $0x18] sm:$0xff]  ;;  %v181_v10 = vld [vmem:[%s579_s25 + $0x10] sm:$0xff] }
  0x10   : > { %466 = vmatpush3.msra.mxu0 %v186_v5  ;;  %501 = vmatpush3.msra.mxu1 %v186_v5  ;;  %v180_v11 = vld [vmem:[%s579_s25 + $0x8] sm:$0xff]  ;;  %v179_v12 = vld [vmem:[%s579_s25] sm:$0xff]  ;;  %v174_v19 = vld [vmem:[%s640_s1 + $0x18] sm:$0xff] }
  0x11   : > { %467 = vmatprep.subr.mxu0 %v185_v6  ;;  %494 = vmatprep.subr.mxu1 %v185_v6  ;;  %v188_v18 = vld [vmem:[%s641_s2 + $0x8] sm:$0xff]  ;;  %v178_v20 = vld [vmem:[%s640_s1 + $0x38] sm:$0xff]  ;;  %v191_v22 = vld [vmem:[%s641_s2 + $0x20] sm:$0xff] }
  0x12   : > { %468 = vmatpush3.msra.mxu0 %v185_v6  ;;  %502 = vmatpush3.msra.mxu1 %v185_v6  ;;  %v192_v21 = vld [vmem:[%s641_s2 + $0x28] sm:$0xff]  ;;  %v194_v23 = vld [vmem:[%s641_s2 + $0x38] sm:$0xff]  ;;  %v193_v24 = vld [vmem:[%s641_s2 + $0x30] sm:$0xff] }
  0x13   : > { %469 = vmatprep.subr.mxu0 %v184_v7  ;;  %495 = vmatprep.subr.mxu1 %v184_v7 }
  0x14   : > { %470 = vmatpush3.msra.mxu0 %v184_v7  ;;  %503 = vmatpush3.msra.mxu1 %v184_v7 }
  0x15   : > { %471 = vmatprep.subr.mxu0 %v183_v8  ;;  %496 = vmatprep.subr.mxu1 %v183_v8 }
  0x16   : > { %472 = vmatpush3.msra.mxu0 %v183_v8  ;;  %504 = vmatpush3.msra.mxu1 %v183_v8 }
  0x17   : > { %473 = vmatprep.subr.mxu0 %v182_v9  ;;  %497 = vmatprep.subr.mxu1 %v182_v9 }
  0x18   : > { %474 = vmatpush3.msra.mxu0 %v182_v9  ;;  %505 = vmatpush3.msra.mxu1 %v182_v9 }
  0x19   : > { %475 = vmatprep.subr.mxu0 %v181_v10  ;;  %498 = vmatprep.subr.mxu1 %v181_v10 }
  0x1a   : > { %476 = vmatpush3.msra.mxu0 %v181_v10  ;;  %506 = vmatpush3.msra.mxu1 %v181_v10 }
  0x1b   : > { %477 = vmatprep.subr.mxu0 %v180_v11  ;;  %499 = vmatprep.subr.mxu1 %v180_v11 }
  0x1c   : > { %478 = vmatpush3.msra.mxu0 %v180_v11  ;;  %507 = vmatpush3.msra.mxu1 %v180_v11 }
  0x1d   : > { %479 = vmatprep.subr.mxu0 %v179_v12  ;;  %500 = vmatprep.subr.mxu1 %v179_v12 }
  0x1e   : > { %480 = vmatpush3.msra.mxu0 %v179_v12  ;;  %508 = vmatpush3.msra.mxu1 %v179_v12 }
  0x1f   : > { %482 = vmatmul.mubr.msk.f32.vlgmr.msra.gmra.mxu0 %vm235_vm0, %v172_v13  ;;  %488 = vmatmul.mubr.msk.f32.vlgmr.msra.gmra.mxu1 %vm235_vm0, %v176_v14 }
  0x20   : > { %484 = vmatprep.mubr.msk.f32.mxu0 %vm235_vm0, %v173_v15  ;;  %490 = vmatprep.mubr.msk.f32.mxu1 %vm235_vm0, %v177_v16 }
  0x21   : > { %212 = vperm.xlu1 %519, %v190_v17   ;;  %202 = vperm.xlu0 %518, %v188_v18  }
  0x23   : > { %485 = vmatmul.mubr.msk.f32.gmra.mxu0 %vm235_vm0, %v174_v19  ;;  %491 = vmatmul.mubr.msk.f32.gmra.mxu1 %vm235_vm0, %v178_v20 }
  0x25   : > { %222 = vperm.xlu1 %519, %v192_v21   ;;  %217 = vperm.xlu0 %518, %v191_v22  }
  0x29   : > { %232 = vperm.xlu1 %519, %v194_v23   ;;  %227 = vperm.xlu0 %518, %v193_v24  }
  0x89   : > { %v208_v25 = vpop.permute.xlu1 %207  ;;  %v198_v26 = vpop.permute.xlu0 %197 }
  0x9c   : > { %v213_v27 = vpop.permute.xlu1 %212  ;;  %v203_v28 = vpop.permute.xlu0 %202 }
  0xa0   : > { %v223_v29 = vpop.permute.xlu1 %222  ;;  %v218_v30 = vpop.permute.xlu0 %217 }
  0xa4   : > { %v233_v37 = vpop.permute.xlu1 %232  ;;  %v228_v42 = vpop.permute.xlu0 %227 }
  0xdf   : > { %v483_v31 = vpop.f32.mrf.mxu0  ;;  %v489_v32 = vpop.f32.mrf.mxu1 }
  0xe0   : > { %v332_v33 = vadd.f32 %v483_v31, %v203_v28  ;;  %v352_v34 = vadd.f32 %v489_v32, %v223_v29 }
  0xe1   : > { %v326_v35 = vpop.f32.mrf.mxu0  ;;  %v346_v36 = vpop.f32.mrf.mxu1 }
  0xe2   : > { %366 = vst [vmem:[%s170_s28 + $0x8] sm:$0xff] %v332_v33  ;;  %370 = vst [vmem:[%s170_s28 + $0x28] sm:$0xff] %v352_v34  ;;  %v327_v38 = vadd.f32 %v326_v35, %v198_v26  ;;  %v347_v39 = vadd.f32 %v346_v36, %v218_v30 }
  0xe3   : > { %v486_v40 = vpop.f32.mrf.mxu0  ;;  %v492_v41 = vpop.f32.mrf.mxu1 }
  0xe4   : > { %365 = vst [vmem:[%s170_s28] sm:$0xff] %v327_v38  ;;  %369 = vst [vmem:[%s170_s28 + $0x20] sm:$0xff] %v347_v39  ;;  %v342_v43 = vadd.f32 %v486_v40, %v213_v27  ;;  %v362_v44 = vadd.f32 %v492_v41, %v233_v37 }
  0xe5   : > { %v336_v45 = vpop.f32.mrf.mxu0  ;;  %v356_v46 = vpop.f32.mrf.mxu1 }
  0xe6   : > { %368 = vst [vmem:[%s170_s28 + $0x18] sm:$0xff] %v342_v43  ;;  %372 = vst [vmem:[%s170_s28 + $0x38] sm:$0xff] %v362_v44  ;;  %v337_v47 = vadd.f32 %v336_v45, %v208_v25  ;;  %v357_v48 = vadd.f32 %v356_v46, %v228_v42 }
  0xe8   : > { %367 = vst [vmem:[%s170_s28 + $0x10] sm:$0xff] %v337_v47  ;;  %371 = vst [vmem:[%s170_s28 + $0x30] sm:$0xff] %v357_v48 }
  0xe9 PF: > { %s13_s12 = sadd.s32 1, %s526_s12  }
  0xea   : > { %p10_p4 = scmp.ge.s32.totalorder %s13_s12, 4  }
  0xec   :  { %12 = sbr.rel (!%p10_p4) target bundleno = 1 (0x1), region = 62 }

// kernel: oafilter_gnn_forward.16
= control target key start
LH: loop header
LB: loop body
LE: loop exit
PB: predicated region body
PF: predicated region fallthrough
CT: control target
= control target key end

     0   :  { %s578_s18 = smov 0   ;;  %s667_s0 = inlined_call_operand.vmem [shape: f32[2,32,128], index: 0, kind: input, shape index: {}]   ;;  %s668_s1 = inlined_call_operand.vmem [shape: f32[1,128], index: 1, kind: input, shape index: {}]   ;;  %s669_s2 = inlined_call_operand.vmem [shape: f32[1,128], index: 2, kind: input, shape index: {}]   ;;  %s670_s3 = inlined_call_operand.vmem [shape: f32[128,128], index: 3, kind: input, shape index: {}]   ;;  %s671_s4 = inlined_call_operand.vmem [shape: f32[1,128], index: 4, kind: input, shape index: {}]   ;;  %s672_s5 = inlined_call_operand.vmem [shape: f32[2,32,128], index: 5, kind: output, shape index: {}]  }
   0x1 LB: > { %s426_s19 = sadd.s32 4294967295, %s546_s18   ;;  %p430_p0 = scmp.ge.s32.totalorder %s546_s18, 1  ;;  %s546_s18 = sphi %s578_s18, %s15_s18  }
   0x2   : > { %p187_p1 = scmp.lt.s32.totalorder %s546_s18, 3 }
   0x4   : > { %p188_p2 = pnand %p430_p0, %p187_p1 }
   0x5   : > { %p215_p3 = scmp.lt.s32.totalorder (!%p188_p2), %s426_s19, 1 }
   0x6   : > { %191 = sbr.rel (%p188_p2) target bundleno = 245 (0xf5), region = 40 }
   0xb   : > { %v270_v0 = vld [vmem:[%s670_s3 + $0x78] sm:$0xff]  ;;  %v269_v1 = vld [vmem:[%s670_s3 + $0x70] sm:$0xff]  ;;  %v268_v2 = vld [vmem:[%s670_s3 + $0x68] sm:$0xff]  ;;  %s674_s19 = smov (!%p215_p3, %s426_s19), 1 }
   0xc   : > { %462 = vmatprep.subr.mxu0 %v270_v0  ;;  %500 = vmatprep.subr.mxu1 %v270_v0  ;;  %v267_v3 = vld [vmem:[%s670_s3 + $0x60] sm:$0xff]  ;;  %v266_v4 = vld [vmem:[%s670_s3 + $0x58] sm:$0xff]  ;;  %v265_v5 = vld [vmem:[%s670_s3 + $0x50] sm:$0xff]  ;;  %s440_s11 = sshll.u32 %s674_s19, 5 }
   0xd   : > { %463 = vmatpush3.msra.mxu0 %v270_v0  ;;  %516 = vmatpush3.msra.mxu1 %v270_v0  ;;  %v264_v6 = vld [vmem:[%s670_s3 + $0x48] sm:$0xff]  ;;  %v263_v7 = vld [vmem:[%s670_s3 + $0x40] sm:$0xff]  ;;  %v262_v8 = vld [vmem:[%s670_s3 + $0x38] sm:$0xff]  ;;  %s219_s16 = scalar_lea.vmem %s667_s0, %s440_s11  ;;  %s224_s17 = scalar_lea.vmem %s672_s5, %s440_s11 }
   0xe   : > { %464 = vmatprep.subr.mxu0 %v269_v1  ;;  %501 = vmatprep.subr.mxu1 %v269_v1  ;;  %v261_v9 = vld [vmem:[%s670_s3 + $0x30] sm:$0xff]  ;;  %v260_v10 = vld [vmem:[%s670_s3 + $0x28] sm:$0xff]  ;;  %v627_v11 = vld [vmem:[%s219_s16] sm:$0xff] }
   0xf   : > { %465 = vmatpush3.msra.mxu0 %v269_v1  ;;  %517 = vmatpush3.msra.mxu1 %v269_v1  ;;  %v435_v12 = vld [vmem:[%s668_s1] ss:$0 sm:$0xff]  ;;  %v632_v13 = vld [vmem:[%s219_s16 + $0x10] sm:$0xff]  ;;  %v226_v14 = vld [vmem:[%s219_s16 + $0x8] sm:$0xff] }
  0x10   : > { %466 = vmatprep.subr.mxu0 %v268_v2  ;;  %502 = vmatprep.subr.mxu1 %v268_v2  ;;  %v228_v15 = vld [vmem:[%s219_s16 + $0x18] sm:$0xff]  ;;  %v259_v16 = vld [vmem:[%s670_s3 + $0x20] sm:$0xff]  ;;  %v236_v17 = vmul.f32 %v435_v12, %v627_v11  ;;  %v238_v18 = vmul.f32 %v435_v12, %v632_v13  ;;  %v237_v21 = vmul.f32 %v435_v12, %v226_v14  ;;  %v257_v23 = vld [vmem:[%s670_s3 + $0x10] sm:$0xff] }
  0x11   : > { %467 = vmatpush3.msra.mxu0 %v268_v2  ;;  %518 = vmatpush3.msra.mxu1 %v268_v2  ;;  %v258_v19 = vld [vmem:[%s670_s3 + $0x18] sm:$0xff]  ;;  %v436_v20 = vld [vmem:[%s669_s2] ss:$0 sm:$0xff]  ;;  %v239_v22 = vmul.f32 %v435_v12, %v228_v15  ;;  %v256_v26 = vld [vmem:[%s670_s3 + $0x8] sm:$0xff] }
  0x12   : > { %468 = vmatprep.subr.mxu0 %v267_v3  ;;  %503 = vmatprep.subr.mxu1 %v267_v3  ;;  %v247_v24 = vadd.f32 %v436_v20, %v236_v17  ;;  %v249_v25 = vadd.f32 %v436_v20, %v238_v18  ;;  %v248_v27 = vadd.f32 %v436_v20, %v237_v21  ;;  %v255_v29 = vld [vmem:[%s670_s3] sm:$0xff] }
  0x13   : > { %469 = vmatpush3.msra.mxu0 %v267_v3  ;;  %519 = vmatpush3.msra.mxu1 %v267_v3  ;;  %v250_v28 = vadd.f32 %v436_v20, %v239_v22  ;;  %v437_v34 = vld [vmem:[%s671_s4] ss:$0 sm:$0xff] }
  0x14   : > { %470 = vmatprep.subr.mxu0 %v266_v4  ;;  %504 = vmatprep.subr.mxu1 %v266_v4  ;;  %v251_v30 = vmax.f32 %v247_v24, 0.0  ;;  %v253_v31 = vmax.f32 %v249_v25, 0.0  ;;  %v252_v32 = vmax.f32 %v248_v27, 0.0 }
  0x15   : > { %471 = vmatpush3.msra.mxu0 %v266_v4  ;;  %520 = vmatpush3.msra.mxu1 %v266_v4  ;;  %v254_v33 = vmax.f32 %v250_v28, 0.0 }
  0x16   : > { %472 = vmatprep.subr.mxu0 %v265_v5  ;;  %505 = vmatprep.subr.mxu1 %v265_v5 }
  0x17   : > { %473 = vmatpush3.msra.mxu0 %v265_v5  ;;  %521 = vmatpush3.msra.mxu1 %v265_v5 }
  0x18   : > { %474 = vmatprep.subr.mxu0 %v264_v6  ;;  %506 = vmatprep.subr.mxu1 %v264_v6 }
  0x19   : > { %475 = vmatpush3.msra.mxu0 %v264_v6  ;;  %522 = vmatpush3.msra.mxu1 %v264_v6 }
  0x1a   : > { %476 = vmatprep.subr.mxu0 %v263_v7  ;;  %507 = vmatprep.subr.mxu1 %v263_v7 }
  0x1b   : > { %477 = vmatpush3.msra.mxu0 %v263_v7  ;;  %523 = vmatpush3.msra.mxu1 %v263_v7 }
  0x1c   : > { %478 = vmatprep.subr.mxu0 %v262_v8  ;;  %508 = vmatprep.subr.mxu1 %v262_v8 }
  0x1d   : > { %479 = vmatpush3.msra.mxu0 %v262_v8  ;;  %524 = vmatpush3.msra.mxu1 %v262_v8 }
  0x1e   : > { %480 = vmatprep.subr.mxu0 %v261_v9  ;;  %509 = vmatprep.subr.mxu1 %v261_v9 }
  0x1f   : > { %481 = vmatpush3.msra.mxu0 %v261_v9  ;;  %525 = vmatpush3.msra.mxu1 %v261_v9 }
  0x20   : > { %482 = vmatprep.subr.mxu0 %v260_v10  ;;  %510 = vmatprep.subr.mxu1 %v260_v10 }
  0x21   : > { %483 = vmatpush3.msra.mxu0 %v260_v10  ;;  %526 = vmatpush3.msra.mxu1 %v260_v10 }
  0x22   : > { %484 = vmatprep.subr.mxu0 %v259_v16  ;;  %511 = vmatprep.subr.mxu1 %v259_v16 }
  0x23   : > { %485 = vmatpush3.msra.mxu0 %v259_v16  ;;  %527 = vmatpush3.msra.mxu1 %v259_v16 }
  0x24   : > { %486 = vmatprep.subr.mxu0 %v258_v19  ;;  %512 = vmatprep.subr.mxu1 %v258_v19 }
  0x25   : > { %487 = vmatpush3.msra.mxu0 %v258_v19  ;;  %528 = vmatpush3.msra.mxu1 %v258_v19 }
  0x26   : > { %488 = vmatprep.subr.mxu0 %v257_v23  ;;  %513 = vmatprep.subr.mxu1 %v257_v23 }
  0x27   : > { %489 = vmatpush3.msra.mxu0 %v257_v23  ;;  %529 = vmatpush3.msra.mxu1 %v257_v23 }
  0x28   : > { %490 = vmatprep.subr.mxu0 %v256_v26  ;;  %514 = vmatprep.subr.mxu1 %v256_v26 }
  0x29   : > { %491 = vmatpush3.msra.mxu0 %v256_v26  ;;  %530 = vmatpush3.msra.mxu1 %v256_v26 }
  0x2a   : > { %492 = vmatprep.subr.mxu0 %v255_v29  ;;  %515 = vmatprep.subr.mxu1 %v255_v29 }
  0x2b   : > { %493 = vmatpush3.msra.mxu0 %v255_v29  ;;  %531 = vmatpush3.msra.mxu1 %v255_v29 }
  0x2c   : > { %494 = vmatprep.mubr.f32.mxu0 %v251_v30  ;;  %497 = vmatprep.mubr.f32.mxu1 %v253_v31 }
  0x2d   : > { %495 = vmatmul.mubr.f32.vlgmr.msra.gmra.mxu0 %v252_v32  ;;  %498 = vmatmul.mubr.f32.vlgmr.msra.gmra.mxu1 %v254_v33 }
  0xed   : > { %v496_v35 = vpop.f32.mrf.mxu0  ;;  %v499_v36 = vpop.f32.mrf.mxu1 }
  0xee   : > { %v350_v37 = vadd.f32 %v496_v35, %v437_v34  ;;  %v360_v38 = vadd.f32 %v499_v36, %v437_v34 }
  0xef   : > { %v344_v39 = vpop.f32.mrf.mxu0  ;;  %v354_v40 = vpop.f32.mrf.mxu1 }
  0xf0   : > { %v364_v41 = vadd.f32 %v350_v37, %v226_v14  ;;  %v366_v42 = vadd.f32 %v360_v38, %v228_v15  ;;  %v345_v43 = vadd.f32 %v437_v34, %v344_v39  ;;  %v355_v44 = vadd.f32 %v437_v34, %v354_v40 }
  0xf2   : > { %368 = vst [vmem:[%s224_s17 + $0x8] sm:$0xff] %v364_v41  ;;  %370 = vst [vmem:[%s224_s17 + $0x18] sm:$0xff] %v366_v42  ;;  %v363_v45 = vadd.f32 %v345_v43, %v627_v11  ;;  %v365_v46 = vadd.f32 %v355_v44, %v632_v13 }
  0xf4   : > { %367 = vst [vmem:[%s224_s17] sm:$0xff] %v363_v45  ;;  %369 = vst [vmem:[%s224_s17 + $0x10] sm:$0xff] %v365_v46 }
  0xf5 PF: > { %s15_s18 = sadd.s32 1, %s546_s18  }
  0xf6   : > { %p12_p4 = scmp.ge.s32.totalorder %s15_s18, 4  }
  0xf8   :  { %14 = sbr.rel (!%p12_p4) target bundleno = 1 (0x1), region = 70 }

// kernel: oafilter_gnn_forward.15
= control target key start
LH: loop header
LB: loop body
LE: loop exit
PB: predicated region body
PF: predicated region fallthrough
CT: control target
= control target key end

     0   :  { %s655_s18 = smov 0   ;;  %s766_s0 = inlined_call_operand.vmem [shape: f32[2,64,128], index: 0, kind: input, shape index: {}]   ;;  %s767_s1 = inlined_call_operand.vmem [shape: f32[64,1], index: 1, kind: input, shape index: {}]   ;;  %s768_s2 = inlined_call_operand.vmem [shape: f32[64,1], index: 2, kind: input, shape index: {}]   ;;  %s769_s3 = inlined_call_operand.vmem [shape: f32[32,64], index: 3, kind: input, shape index: {}]   ;;  %s770_s4 = inlined_call_operand.vmem [shape: f32[32,1], index: 4, kind: input, shape index: {}]   ;;  %s771_s5 = inlined_call_operand.vmem [shape: f32[2,32,128], index: 5, kind: output, shape index: {}]  }
   0x1 LB: > { %s538_s19 = sadd.s32 4294967295, %s622_s18   ;;  %p542_p0 = scmp.ge.s32.totalorder %s622_s18, 1  ;;  %s622_s18 = sphi %s655_s18, %s15_s18  }
   0x2   : > { %p187_p1 = scmp.lt.s32.totalorder %s622_s18, 3 }
   0x4   : > { %p188_p2 = pnand %p542_p0, %p187_p1 }
   0x5   : > { %p215_p3 = scmp.lt.s32.totalorder (!%p188_p2), %s538_s19, 1 }
   0x6   : > { %191 = sbr.rel (%p188_p2) target bundleno = 371 (0x173), region = 40 }
   0xb   : > { %v296_v0 = vld [vmem:[%s768_s2 + $0x38] sm:$0xff]  ;;  %v624_v2 = vmov 0   ;;  %v239_v3 = vld [vmem:[%s767_s1 + $0x30] sm:$0xff]  ;;  %v238_v4 = vld [vmem:[%s767_s1 + $0x28] sm:$0xff]  ;;  %vm381_vm0 = vcmask 523264   ;;  %s773_s19 = smov (!%p215_p3, %s538_s19), 1 }
   0xc   : > { %v240_v1 = vld [vmem:[%s767_s1 + $0x38] sm:$0xff]  ;;  %615 = vset.pattern.permute.xlu1 %v624_v2  ;;  %614 = vset.pattern.permute.xlu0 %v624_v2  ;;  %v295_v5 = vld [vmem:[%s768_s2 + $0x30] sm:$0xff]  ;;  %v237_v6 = vld [vmem:[%s767_s1 + $0x20] sm:$0xff]  ;;  %s553_s16 = sshll.u32 %s773_s19, 6  ;;  %s554_s26 = sshll.u32 %s773_s19, 5 }
   0xd   : > { %334 = vperm.xlu1 %615, %v296_v0   ;;  %278 = vperm.xlu0 %614, %v240_v1   ;;  %v294_v7 = vld [vmem:[%s768_s2 + $0x28] sm:$0xff]  ;;  %v236_v8 = vld [vmem:[%s767_s1 + $0x18] sm:$0xff]  ;;  %v293_v9 = vld [vmem:[%s768_s2 + $0x20] sm:$0xff]  ;;  %s741_s21 = scalar_lea.vmem %s766_s0, %s553_s16  ;;  %s224_s29 = scalar_lea.vmem %s771_s5, %s554_s26 }
   0xe   : > { %v235_v10 = vld [vmem:[%s767_s1 + $0x10] sm:$0xff]  ;;  %v292_v11 = vld [vmem:[%s768_s2 + $0x18] sm:$0xff]  ;;  %v234_v12 = vld [vmem:[%s767_s1 + $0x8] sm:$0xff] }
   0xf   : > { %v291_v13 = vld [vmem:[%s768_s2 + $0x10] sm:$0xff]  ;;  %v233_v14 = vld [vmem:[%s767_s1] sm:$0xff]  ;;  %v290_v15 = vld [vmem:[%s768_s2 + $0x8] sm:$0xff] }
  0x10   : > { %v289_v16 = vld [vmem:[%s768_s2] sm:$0xff]  ;;  %v358_v18 = vld [vmem:[%s770_s4 + $0x8] sm:$0xff]  ;;  %v355_v20 = vld [vmem:[%s769_s3 + $0x10] sm:$0xff] }
  0x11   : > { %273 = vperm.xlu0 %614, %v239_v3   ;;  %268 = vperm.xlu1 %615, %v238_v4   ;;  %v357_v17 = vld [vmem:[%s770_s4] sm:$0xff]  ;;  %v359_v21 = vld [vmem:[%s770_s4 + $0x10] sm:$0xff]  ;;  %v360_v22 = vld [vmem:[%s770_s4 + $0x18] sm:$0xff] }
  0x12   : > { %v353_v19 = vld [vmem:[%s769_s3] sm:$0xff]  ;;  %586 = vmatprep.mubr.msk.f32.mxu1 %vm381_vm0, %v355_v20  ;;  %v232_v23 = vld [vmem:[%s741_s21 + $0x38] sm:$0xff]  ;;  %v231_v29 = vld [vmem:[%s741_s21 + $0x30] sm:$0xff] }
  0x13   : > { %583 = vmatprep.mubr.msk.f32.mxu0 %vm381_vm0, %v353_v19  ;;  %v230_v33 = vld [vmem:[%s741_s21 + $0x28] sm:$0xff]  ;;  %v229_v39 = vld [vmem:[%s741_s21 + $0x20] sm:$0xff]  ;;  %v228_v45 = vld [vmem:[%s741_s21 + $0x18] sm:$0xff] }
  0x14   : > { %v227_v51 = vld [vmem:[%s741_s21 + $0x10] sm:$0xff]  ;;  %v226_v57 = vld [vmem:[%s741_s21 + $0x8] sm:$0xff]  ;;  %v225_v60 = vld [vmem:[%s741_s21] sm:$0xff] }
  0x15   : > { %329 = vperm.xlu0 %614, %v295_v5   ;;  %263 = vperm.xlu1 %615, %v237_v6  }
  0x19   : > { %324 = vperm.xlu0 %614, %v294_v7   ;;  %258 = vperm.xlu1 %615, %v236_v8   ;;  %v354_v7 = vld [vmem:[%s769_s3 + $0x8] sm:$0xff]  ;;  %v356_v8 = vld [vmem:[%s769_s3 + $0x18] sm:$0xff] }
  0x1d   : > { %319 = vperm.xlu0 %614, %v293_v9   ;;  %253 = vperm.xlu1 %615, %v235_v10  }
  0x21   : > { %314 = vperm.xlu0 %614, %v292_v11   ;;  %248 = vperm.xlu1 %615, %v234_v12  }
  0x25   : > { %309 = vperm.xlu0 %614, %v291_v13   ;;  %243 = vperm.xlu1 %615, %v233_v14  }
  0x29   : > { %304 = vperm.xlu0 %614, %v290_v15   ;;  %299 = vperm.xlu1 %615, %v289_v16  }
  0x2d   : > { %363 = vperm.xlu0 %614, %v357_v17   ;;  %368 = vperm.xlu1 %615, %v358_v18  }
  0x31   : > { %373 = vperm.xlu0 %614, %v359_v21   ;;  %378 = vperm.xlu1 %615, %v360_v22  }
  0x88   : > { %v335_v24 = vpop.permute.xlu1 %334  ;;  %v279_v25 = vpop.permute.xlu0 %278 }
  0x89   : > { %v288_v26 = vmul.f32 %v279_v25, %v232_v23 }
  0x8b   : > { %v344_v27 = vadd.f32 %v335_v24, %v288_v26 }
  0x8c   : > { %v274_v28 = vpop.permute.xlu0 %273  ;;  %v269_v30 = vpop.permute.xlu1 %268 }
  0x8d   : > { %v352_v31 = vmax.f32 %v344_v27, 0.0  ;;  %v287_v32 = vmul.f32 %v274_v28, %v231_v29  ;;  %v286_v37 = vmul.f32 %v269_v30, %v230_v33 }
  0x8f   : > { %567 = vmatprep.subr.mxu0 %v352_v31  ;;  %589 = vmatprep.subr.mxu1 %v352_v31 }
  0x90   : > { %v330_v34 = vpop.permute.xlu0 %329  ;;  %v264_v35 = vpop.permute.xlu1 %263  ;;  %568 = vmatpush3.msra.mxu0 %v352_v31  ;;  %597 = vmatpush3.msra.mxu1 %v352_v31 }
  0x91   : > { %v343_v36 = vadd.f32 %v330_v34, %v287_v32  ;;  %v285_v43 = vmul.f32 %v264_v35, %v229_v39 }
  0x93   : > { %v351_v38 = vmax.f32 %v343_v36, 0.0 }
  0x94   : > { %v325_v40 = vpop.permute.xlu0 %324  ;;  %v259_v41 = vpop.permute.xlu1 %258 }
  0x95   : > { %v342_v42 = vadd.f32 %v325_v40, %v286_v37  ;;  %569 = vmatprep.subr.mxu0 %v351_v38  ;;  %590 = vmatprep.subr.mxu1 %v351_v38  ;;  %v284_v49 = vmul.f32 %v259_v41, %v228_v45 }
  0x96   : > { %570 = vmatpush3.msra.mxu0 %v351_v38  ;;  %598 = vmatpush3.msra.mxu1 %v351_v38 }
  0x97   : > { %v350_v44 = vmax.f32 %v342_v42, 0.0 }
  0x98   : > { %v320_v46 = vpop.permute.xlu0 %319  ;;  %v254_v47 = vpop.permute.xlu1 %253 }
  0x99   : > { %v341_v48 = vadd.f32 %v320_v46, %v285_v43  ;;  %571 = vmatprep.subr.mxu0 %v350_v44  ;;  %591 = vmatprep.subr.mxu1 %v350_v44  ;;  %v283_v55 = vmul.f32 %v254_v47, %v227_v51 }
  0x9a   : > { %572 = vmatpush3.msra.mxu0 %v350_v44  ;;  %599 = vmatpush3.msra.mxu1 %v350_v44 }
  0x9b   : > { %v349_v50 = vmax.f32 %v341_v48, 0.0 }
  0x9c   : > { %v315_v52 = vpop.permute.xlu0 %314  ;;  %v249_v53 = vpop.permute.xlu1 %248 }
  0x9d   : > { %v340_v54 = vadd.f32 %v315_v52, %v284_v49  ;;  %573 = vmatprep.subr.mxu0 %v349_v50  ;;  %592 = vmatprep.subr.mxu1 %v349_v50  ;;  %v282_v62 = vmul.f32 %v249_v53, %v226_v57 }
  0x9e   : > { %574 = vmatpush3.msra.mxu0 %v349_v50  ;;  %600 = vmatpush3.msra.mxu1 %v349_v50 }
  0x9f   : > { %v348_v56 = vmax.f32 %v340_v54, 0.0 }
  0xa0   : > { %v310_v58 = vpop.permute.xlu0 %309  ;;  %v244_v59 = vpop.permute.xlu1 %243 }
  0xa1   : > { %v339_v61 = vadd.f32 %v310_v58, %v283_v55  ;;  %575 = vmatprep.subr.mxu0 %v348_v56  ;;  %593 = vmatprep.subr.mxu1 %v348_v56  ;;  %v281_v0 = vmul.f32 %v244_v59, %v225_v60 }
  0xa2   : > { %576 = vmatpush3.msra.mxu0 %v348_v56  ;;  %601 = vmatpush3.msra.mxu1 %v348_v56 }
  0xa3   : > { %v347_v63 = vmax.f32 %v339_v61, 0.0 }
  0xa4   : > { %v305_v1 = vpop.permute.xlu0 %304  ;;  %v300_v2 = vpop.permute.xlu1 %299 }
  0xa5   : > { %v338_v3 = vadd.f32 %v305_v1, %v282_v62  ;;  %v337_v4 = vadd.f32 %v300_v2, %v281_v0  ;;  %577 = vmatprep.subr.mxu0 %v347_v63  ;;  %594 = vmatprep.subr.mxu1 %v347_v63 }
  0xa6   : > { %578 = vmatpush3.msra.mxu0 %v347_v63  ;;  %602 = vmatpush3.msra.mxu1 %v347_v63 }
  0xa7   : > { %v346_v5 = vmax.f32 %v338_v3, 0.0  ;;  %v345_v6 = vmax.f32 %v337_v4, 0.0 }
  0xa8   : > { %v369_v9 = vpop.permute.xlu1 %368  ;;  %v364_v10 = vpop.permute.xlu0 %363 }
  0xa9   : > { %579 = vmatprep.subr.mxu0 %v346_v5  ;;  %595 = vmatprep.subr.mxu1 %v346_v5 }
  0xaa   : > { %580 = vmatpush3.msra.mxu0 %v346_v5  ;;  %603 = vmatpush3.msra.mxu1 %v346_v5 }
  0xab   : > { %581 = vmatprep.subr.mxu0 %v345_v6  ;;  %596 = vmatprep.subr.mxu1 %v345_v6 }
  0xac   : > { %582 = vmatpush3.msra.mxu0 %v345_v6  ;;  %604 = vmatpush3.msra.mxu1 %v345_v6  ;;  %v379_v11 = vpop.permute.xlu1 %378  ;;  %v374_v14 = vpop.permute.xlu0 %373 }
  0xad   : > { %584 = vmatmul.mubr.msk.f32.vlgmr.msra.gmra.mxu0 %vm381_vm0, %v354_v7  ;;  %587 = vmatmul.mubr.msk.f32.vlgmr.msra.gmra.mxu1 %vm381_vm0, %v356_v8 }
 0x16d   : > { %v585_v12 = vpop.f32.mrf.mxu0  ;;  %v588_v13 = vpop.f32.mrf.mxu1 }
 0x16e   : > { %v466_v15 = vadd.f32 %v585_v12, %v369_v9  ;;  %v476_v16 = vadd.f32 %v588_v13, %v379_v11 }
 0x16f   : > { %v460_v17 = vpop.f32.mrf.mxu0  ;;  %v470_v18 = vpop.f32.mrf.mxu1 }
 0x170   : > { %480 = vst [vmem:[%s224_s29 + $0x8] sm:$0xff] %v466_v15  ;;  %482 = vst [vmem:[%s224_s29 + $0x18] sm:$0xff] %v476_v16  ;;  %v461_v19 = vadd.f32 %v460_v17, %v364_v10  ;;  %v471_v20 = vadd.f32 %v470_v18, %v374_v14 }
 0x172   : > { %479 = vst [vmem:[%s224_s29] sm:$0xff] %v461_v19  ;;  %481 = vst [vmem:[%s224_s29 + $0x10] sm:$0xff] %v471_v20 }
 0x173 PF: > { %s15_s18 = sadd.s32 1, %s622_s18  }
 0x174   : > { %p12_p4 = scmp.ge.s32.totalorder %s15_s18, 4  }
 0x176   :  { %14 = sbr.rel (!%p12_p4) target bundleno = 1 (0x1), region = 70 }

// kernel: oafilter_gnn_forward.21
= control target key start
LH: loop header
LB: loop body
LE: loop exit
PB: predicated region body
PF: predicated region fallthrough
CT: control target
= control target key end

     0   :  { %11 = vsyncpa [#allocation3], 0  ;;  %s1039_s0 = inlined_call_operand.vmem [shape: f32[2,64,128], index: 0, kind: input, shape index: {}]   ;;  %s1040_s1 = inlined_call_operand.vmem [shape: f32[64,1], index: 1, kind: input, shape index: {}]   ;;  %s1041_s2 = inlined_call_operand.vmem [shape: f32[64,1], index: 2, kind: input, shape index: {}]   ;;  %s1042_s3 = inlined_call_operand.vmem [shape: f32[32,64], index: 3, kind: input, shape index: {}]   ;;  %s1043_s4 = inlined_call_operand.vmem [shape: f32[32,1], index: 4, kind: input, shape index: {}]   ;;  %s1044_s5 = inlined_call_operand.vmem [shape: f32[2,32,128], index: 5, kind: input, shape index: {}]   ;;  %s1045_s6 = inlined_call_operand.hbm [shape: f32[2,32,128], index: 6, kind: output, shape index: {}]  }
   0x1   :  { %13 = vsyncpa [#allocation3 + $0x1], 0  ;;  %s840_s21 = smov 0   ;;  %s842_s22 = smov 0  }
   0x2   :  { %s844_s23 = smov 0   ;;  %s846_s24 = smov 0  }
   0x3 LB: > { %s861_s25 = sadd.s32 4294967295, %s799_s24   ;;  %s624_s26 = sadd.s32 4294967294, %s799_s24   ;;  %s799_s24 = sphi %s846_s24, %s1051_s24   ;;  %s795_s23 = sphi %s844_s23, %s1050_s23   ;;  %s791_s22 = sphi %s842_s22, %s1049_s22   ;;  %s787_s21 = sphi %s840_s21, %s1048_s21  }
   0x4   : > { %s865_s27 = sadd.s32 1, %s799_s24   ;;  %s162_s28 = sadd.s32 1, %s795_s23 }
   0x5   : > { %s159_s29 = ssub.s32 %s799_s24, %s865_s27  ;;  %p172_p0 = scmp.ne.s32.totalorder %s795_s23, %s791_s22 }
   0x6   : > { %p160_p1 = scmp.eq.s32.totalorder %s159_s29, 0  ;;  %p173_p2 = scmp.eq.s32.totalorder %s861_s25, 1 }
   0x7   : > { %p178_p3 = scmp.ne.s32.totalorder %s791_s22, %s787_s21  ;;  %p179_p4 = scmp.eq.s32.totalorder %s624_s26, 1 }
   0x8   : > { %s876_s30 = scalar_select %p160_p1, %s795_s23, %s162_s28  }
   0x9   : > { %p878_p5 = por %p173_p2, %p172_p0  ;;  %p882_p6 = por %p179_p4, %p178_p3 }
   0xa   : > { %p627_p7 = scmp.ge.s32.totalorder %s799_s24, 1  ;;  %p225_p8 = scmp.lt.s32.totalorder %s799_s24, 3 }
   0xc   : > { %p226_p9 = pnand %p627_p7, %p225_p8 }
   0xd   : > { %p260_p10 = scmp.lt.s32.totalorder (!%p226_p9), %s861_s25, 1  ;;  %s257_s17 = sand.u32 (!%p226_p9), 1, %s791_s22  }
   0xe   : > { %229 = sbr.rel (%p226_p9) target bundleno = 394 (0x18a), region = 44  ;;  %s628_s19 = sshll.u32 (!%p226_p9), %s257_s17, 5 }
   0xf   : > { %s644_s11 = sshll.u32 (!%p226_p9), %s861_s25, 9  ;;  %s802_s15 = smov (!%p226_p9), [#allocation2]  }
  0x10   : > { %s995_s13 = scalar_lea.hbm (!%p226_p9), %s1045_s6, %s644_s11  ;;  %s743_s16 = sshll.u32 (!%p226_p9), %s802_s15, 4  ;;  %s744_s16 = int_to_ptr.vmem [resolvable:$false] %s743_s16 }
  0x13   : > { %v341_v0 = vld [vmem:[%s1041_s2 + $0x38] sm:$0xff]  ;;  %v801_v2 = vmov 0   ;;  %v284_v3 = vld [vmem:[%s1040_s1 + $0x30] sm:$0xff]  ;;  %v283_v4 = vld [vmem:[%s1040_s1 + $0x28] sm:$0xff]  ;;  %vm426_vm0 = vcmask 523264   ;;  %s958_s29 = scalar_select %p260_p10, %s861_s25, 1 }
  0x14   : > { %v285_v1 = vld [vmem:[%s1040_s1 + $0x38] sm:$0xff]  ;;  %738 = vset.pattern.permute.xlu1 %v801_v2  ;;  %737 = vset.pattern.permute.xlu0 %v801_v2  ;;  %v340_v5 = vld [vmem:[%s1041_s2 + $0x30] sm:$0xff]  ;;  %v282_v6 = vld [vmem:[%s1040_s1 + $0x20] sm:$0xff]  ;;  %s999_s25 = scalar_lea.sflag [#allocation3], %s257_s17 }
  0x15   : > { %379 = vperm.xlu1 %738, %v341_v0   ;;  %323 = vperm.xlu0 %737, %v285_v1   ;;  %v339_v7 = vld [vmem:[%s1041_s2 + $0x28] sm:$0xff]  ;;  %v281_v8 = vld [vmem:[%s1040_s1 + $0x18] sm:$0xff]  ;;  %v338_v9 = vld [vmem:[%s1041_s2 + $0x20] sm:$0xff]  ;;  %s642_s9 = sshll.u32 %s958_s29, 6  ;;  %s643_s18 = sshll.u32 %s958_s29, 5 }
  0x16   : > { %v280_v10 = vld [vmem:[%s1040_s1 + $0x10] sm:$0xff]  ;;  %v337_v11 = vld [vmem:[%s1041_s2 + $0x18] sm:$0xff]  ;;  %v279_v12 = vld [vmem:[%s1040_s1 + $0x8] sm:$0xff]  ;;  %s964_s12 = scalar_lea.vmem %s1039_s0, %s642_s9  ;;  %s269_s28 = scalar_lea.vmem %s1044_s5, %s643_s18 }
  0x17   : > { %v336_v13 = vld [vmem:[%s1041_s2 + $0x10] sm:$0xff]  ;;  %v278_v14 = vld [vmem:[%s1040_s1] sm:$0xff]  ;;  %v335_v15 = vld [vmem:[%s1041_s2 + $0x8] sm:$0xff]  ;;  %s259_s9 = scalar_lea.vmem [#allocation2], %s628_s19  ;;  %s745_s18 = scalar_lea.vmem %s744_s16, 1024 }
  0x18   : > { %v334_v16 = vld [vmem:[%s1041_s2] sm:$0xff]  ;;  %v403_v18 = vld [vmem:[%s1043_s4 + $0x8] sm:$0xff]  ;;  %v400_v20 = vld [vmem:[%s1042_s3 + $0x10] sm:$0xff]  ;;  %s550_s10 = sshll.u32 %s259_s9, 4  ;;  %s990_s10 = int_to_ptr.vmem [resolvable:$true] %s550_s10 }
  0x19   : > { %318 = vperm.xlu0 %737, %v284_v3   ;;  %313 = vperm.xlu1 %738, %v283_v4   ;;  %v402_v17 = vld [vmem:[%s1043_s4] sm:$0xff]  ;;  %v404_v21 = vld [vmem:[%s1043_s4 + $0x10] sm:$0xff]  ;;  %v405_v22 = vld [vmem:[%s1043_s4 + $0x18] sm:$0xff]  ;;  %s739_s14 = scalar_lea.vmem %s990_s10, 512  ;;  %p746_p0 = scmp.lt.s32.totalorder %s990_s10, %s744_s16 }
  0x1a   : > { %v398_v19 = vld [vmem:[%s1042_s3] sm:$0xff]  ;;  %676 = vmatprep.mubr.msk.f32.mxu1 %vm426_vm0, %v400_v20  ;;  %v277_v23 = vld [vmem:[%s964_s12 + $0x38] sm:$0xff]  ;;  %v276_v29 = vld [vmem:[%s964_s12 + $0x30] sm:$0xff]  ;;  %p740_p11 = scmp.ne.s32.totalorder %s990_s10, %s739_s14  ;;  %p747_p1 = scmp.lt.s32.totalorder %s745_s18, %s739_s14 }
  0x1b   : > { %673 = vmatprep.mubr.msk.f32.mxu0 %vm426_vm0, %v398_v19  ;;  %v275_v33 = vld [vmem:[%s964_s12 + $0x28] sm:$0xff]  ;;  %v274_v39 = vld [vmem:[%s964_s12 + $0x20] sm:$0xff]  ;;  %v273_v45 = vld [vmem:[%s964_s12 + $0x18] sm:$0xff] }
  0x1c   : > { %v272_v51 = vld [vmem:[%s964_s12 + $0x10] sm:$0xff]  ;;  %v271_v57 = vld [vmem:[%s964_s12 + $0x8] sm:$0xff]  ;;  %v270_v60 = vld [vmem:[%s964_s12] sm:$0xff]  ;;  %p741_p12 = pnand %p740_p11, %p878_p5  ;;  %p748_p2 = por %p747_p1, %p746_p0 }
  0x1d   : > { %374 = vperm.xlu0 %737, %v340_v5   ;;  %308 = vperm.xlu1 %738, %v282_v6   ;;  %v524_v20 = vld [vmem:[%s269_s28] sm:$0xff] }
  0x1e   : > { %p742_p13 = pneg %p741_p12 }
  0x20   : > { %p749_p3 = pnand %p748_p2, %p742_p13 }
  0x21   : > { %369 = vperm.xlu0 %737, %v339_v7   ;;  %303 = vperm.xlu1 %738, %v281_v8   ;;  %v399_v7 = vld [vmem:[%s1042_s3 + $0x8] sm:$0xff]  ;;  %v401_v8 = vld [vmem:[%s1042_s3 + $0x18] sm:$0xff] }
  0x25   : > { %364 = vperm.xlu0 %737, %v338_v9   ;;  %298 = vperm.xlu1 %738, %v280_v10  }
  0x29   : > { %359 = vperm.xlu0 %737, %v337_v11   ;;  %293 = vperm.xlu1 %738, %v279_v12  }
  0x2d   : > { %354 = vperm.xlu0 %737, %v336_v13   ;;  %288 = vperm.xlu1 %738, %v278_v14   ;;  %v525_v13 = vld [vmem:[%s269_s28 + $0x8] sm:$0xff] }
  0x31   : > { %349 = vperm.xlu0 %737, %v335_v15   ;;  %344 = vperm.xlu1 %738, %v334_v16   ;;  %v527_v15 = vld [vmem:[%s269_s28 + $0x18] sm:$0xff] }
  0x35   : > { %408 = vperm.xlu0 %737, %v402_v17   ;;  %413 = vperm.xlu1 %738, %v403_v18  }
  0x39   : > { %418 = vperm.xlu0 %737, %v404_v21   ;;  %423 = vperm.xlu1 %738, %v405_v22   ;;  %v526_v22 = vld [vmem:[%s269_s28 + $0x10] sm:$0xff] }
  0x90   : > { %v380_v24 = vpop.permute.xlu1 %379  ;;  %v324_v25 = vpop.permute.xlu0 %323 }
  0x91   : > { %v333_v26 = vmul.f32 %v324_v25, %v277_v23 }
  0x93   : > { %v389_v27 = vadd.f32 %v380_v24, %v333_v26 }
  0x94   : > { %v319_v28 = vpop.permute.xlu0 %318  ;;  %v314_v30 = vpop.permute.xlu1 %313 }
  0x95   : > { %v397_v31 = vmax.f32 %v389_v27, 0.0  ;;  %v332_v32 = vmul.f32 %v319_v28, %v276_v29  ;;  %v331_v37 = vmul.f32 %v314_v30, %v275_v33 }
  0x97   : > { %657 = vmatprep.subr.mxu0 %v397_v31  ;;  %679 = vmatprep.subr.mxu1 %v397_v31 }
  0x98   : > { %v375_v34 = vpop.permute.xlu0 %374  ;;  %v309_v35 = vpop.permute.xlu1 %308  ;;  %658 = vmatpush3.msra.mxu0 %v397_v31  ;;  %687 = vmatpush3.msra.mxu1 %v397_v31 }
  0x99   : > { %v388_v36 = vadd.f32 %v375_v34, %v332_v32  ;;  %v330_v43 = vmul.f32 %v309_v35, %v274_v39 }
  0x9b   : > { %v396_v38 = vmax.f32 %v388_v36, 0.0 }
  0x9c   : > { %v370_v40 = vpop.permute.xlu0 %369  ;;  %v304_v41 = vpop.permute.xlu1 %303 }
  0x9d   : > { %v387_v42 = vadd.f32 %v370_v40, %v331_v37  ;;  %659 = vmatprep.subr.mxu0 %v396_v38  ;;  %680 = vmatprep.subr.mxu1 %v396_v38  ;;  %v329_v49 = vmul.f32 %v304_v41, %v273_v45 }
  0x9e   : > { %660 = vmatpush3.msra.mxu0 %v396_v38  ;;  %688 = vmatpush3.msra.mxu1 %v396_v38 }
  0x9f   : > { %v395_v44 = vmax.f32 %v387_v42, 0.0 }
  0xa0   : > { %v365_v46 = vpop.permute.xlu0 %364  ;;  %v299_v47 = vpop.permute.xlu1 %298 }
  0xa1   : > { %v386_v48 = vadd.f32 %v365_v46, %v330_v43  ;;  %661 = vmatprep.subr.mxu0 %v395_v44  ;;  %681 = vmatprep.subr.mxu1 %v395_v44  ;;  %v328_v55 = vmul.f32 %v299_v47, %v272_v51 }
  0xa2   : > { %662 = vmatpush3.msra.mxu0 %v395_v44  ;;  %689 = vmatpush3.msra.mxu1 %v395_v44 }
  0xa3   : > { %v394_v50 = vmax.f32 %v386_v48, 0.0 }
  0xa4   : > { %v360_v52 = vpop.permute.xlu0 %359  ;;  %v294_v53 = vpop.permute.xlu1 %293 }
  0xa5   : > { %v385_v54 = vadd.f32 %v360_v52, %v329_v49  ;;  %663 = vmatprep.subr.mxu0 %v394_v50  ;;  %682 = vmatprep.subr.mxu1 %v394_v50  ;;  %v327_v62 = vmul.f32 %v294_v53, %v271_v57 }
  0xa6   : > { %664 = vmatpush3.msra.mxu0 %v394_v50  ;;  %690 = vmatpush3.msra.mxu1 %v394_v50 }
  0xa7   : > { %v393_v56 = vmax.f32 %v385_v54, 0.0 }
  0xa8   : > { %v355_v58 = vpop.permute.xlu0 %354  ;;  %v289_v59 = vpop.permute.xlu1 %288 }
  0xa9   : > { %v384_v61 = vadd.f32 %v355_v58, %v328_v55  ;;  %665 = vmatprep.subr.mxu0 %v393_v56  ;;  %683 = vmatprep.subr.mxu1 %v393_v56  ;;  %v326_v0 = vmul.f32 %v289_v59, %v270_v60 }
  0xaa   : > { %666 = vmatpush3.msra.mxu0 %v393_v56  ;;  %691 = vmatpush3.msra.mxu1 %v393_v56 }
  0xab   : > { %v392_v63 = vmax.f32 %v384_v61, 0.0 }
  0xac   : > { %v350_v1 = vpop.permute.xlu0 %349  ;;  %v345_v2 = vpop.permute.xlu1 %344 }
  0xad   : > { %v383_v3 = vadd.f32 %v350_v1, %v327_v62  ;;  %v382_v4 = vadd.f32 %v345_v2, %v326_v0  ;;  %667 = vmatprep.subr.mxu0 %v392_v63  ;;  %684 = vmatprep.subr.mxu1 %v392_v63 }
  0xae   : > { %668 = vmatpush3.msra.mxu0 %v392_v63  ;;  %692 = vmatpush3.msra.mxu1 %v392_v63 }
  0xaf   : > { %v391_v5 = vmax.f32 %v383_v3, 0.0  ;;  %v390_v6 = vmax.f32 %v382_v4, 0.0 }
  0xb0   : > { %v414_v9 = vpop.permute.xlu1 %413  ;;  %v409_v10 = vpop.permute.xlu0 %408 }
  0xb1   : > { %669 = vmatprep.subr.mxu0 %v391_v5  ;;  %685 = vmatprep.subr.mxu1 %v391_v5 }
  0xb2   : > { %670 = vmatpush3.msra.mxu0 %v391_v5  ;;  %693 = vmatpush3.msra.mxu1 %v391_v5 }
  0xb3   : > { %671 = vmatprep.subr.mxu0 %v390_v6  ;;  %686 = vmatprep.subr.mxu1 %v390_v6 }
  0xb4   : > { %672 = vmatpush3.msra.mxu0 %v390_v6  ;;  %694 = vmatpush3.msra.mxu1 %v390_v6  ;;  %v424_v11 = vpop.permute.xlu1 %423  ;;  %v419_v16 = vpop.permute.xlu0 %418 }
  0xb5   : > { %674 = vmatmul.mubr.msk.f32.vlgmr.msra.gmra.mxu0 %vm426_vm0, %v399_v7  ;;  %677 = vmatmul.mubr.msk.f32.vlgmr.msra.gmra.mxu1 %vm426_vm0, %v401_v8 }
 0x175   : > { %v675_v12 = vpop.f32.mrf.mxu0  ;;  %v678_v14 = vpop.f32.mrf.mxu1 }
 0x176   : > { %v511_v17 = vadd.f32 %v675_v12, %v414_v9  ;;  %v521_v18 = vadd.f32 %v678_v14, %v424_v11 }
 0x177   : > { %v505_v19 = vpop.f32.mrf.mxu0  ;;  %v515_v21 = vpop.f32.mrf.mxu1 }
 0x178   : > { %v529_v23 = vadd.f32 %v525_v13, %v511_v17  ;;  %v531_v24 = vadd.f32 %v527_v15, %v521_v18  ;;  %v506_v25 = vadd.f32 %v505_v19, %v409_v10  ;;  %v516_v26 = vadd.f32 %v515_v21, %v419_v16 }
 0x17a   : > { %533 = vst [vmem:[%s259_s9 + $0x8] sm:$0xff] %v529_v23  ;;  %535 = vst [vmem:[%s259_s9 + $0x18] sm:$0xff] %v531_v24  ;;  %v528_v27 = vadd.f32 %v524_v20, %v506_v25  ;;  %v530_v28 = vadd.f32 %v526_v22, %v516_v26 }
 0x17c   : > { %532 = vst [vmem:[%s259_s9] sm:$0xff] %v528_v27  ;;  %534 = vst [vmem:[%s259_s9 + $0x10] sm:$0xff] %v530_v28 }
 0x17d   : > { %752 = shalt.err (!%p749_p3)
}
 0x17e   : > { %s753_s17 = scalar_lea.hbm %s995_s13, 512  ;;  %s757_s26 = scalar_lea.hbm %s1045_s6, 1024 }
 0x17f   : > { %p754_p4 = scmp.ne.s32.totalorder %s995_s13, %s753_s17  ;;  %p758_p9 = scmp.lt.s32.totalorder %s995_s13, %s1045_s6 }
 0x180   : > { %p759_p10 = scmp.lt.s32.totalorder %s757_s26, %s753_s17 }
 0x181   : > { %p755_p7 = pnand %p754_p4, %p878_p5 }
 0x182   : > { %p760_p11 = por %p759_p10, %p758_p9 }
 0x183   : > { %p756_p8 = pneg %p755_p7 }
 0x185   : > { %p761_p12 = pnand %p760_p11, %p756_p8 }
 0x187   : > { %764 = shalt.err (!%p761_p12)
}
 0x188   : > { %s803_s11 = smov 128   ;;  %s804_s29 = smov 8  }
 0x189   : > { %695 = dma.vmem_to_hbm [thread:$0]  (%p878_p5), %s990_s10, 512, %s995_s13, %s999_s25, %s803_s11, %s803_s11, %s804_s29  }
 0x18a PF: > { %p701_p13 = scmp.ge.s32.totalorder %s799_s24, 2  ;;  %s565_s12 = sand.u32 1, %s787_s21  }
 0x18b   : > { %s566_s14 = scalar_lea.sflag [#allocation3], %s565_s12 }
 0x18c   : > { %p698_p0 = pnand %p701_p13, %p882_p6 }
 0x18e   : > { %p699_p1 = pneg %p698_p0 }
 0x190   : > { %782 = dma.done.wait (%p699_p1), %s566_s14, 512  }
 0x191   : > { %784 = vsyncadd (%p699_p1), %s566_s14, 4294966784  ;;  %p16_p2 = scmp.ge.s32.totalorder %s865_s27, 4   ;;  %s1048_s21 = smov %s791_s22 }
 0x192   : > { %s1049_s22 = smov %s795_s23  ;;  %s1050_s23 = smov %s876_s30 }
 0x193   : > { %s1051_s24 = smov %s865_s27  ;;  %18 = sbr.rel (!%p16_p2) target bundleno = 3 (0x3), region = 82 }
 0x198   :  { %571 = vsyncpa [#allocation3], 1 }
 0x199   :  { %573 = vsyncpa [#allocation3 + $0x1], 1 }

</bundles_post_ra>
